<compile_context>
chip_gen: v7x
topology: tpu7x:2x2x1
jax: 0.10.0
libtpu: 0.0.40
codegen_flags: <defaults>
</compile_context>

<pallas_src>
import functools

import jax
import jax.numpy as jnp
from jax.experimental import pallas as pl
from jax.experimental.pallas import tpu as pltpu


def _clip_adj(a, lo, hi):
    """Exact replica of clip_adjacency_matrix semantics (clamp, zero bounds, binarize > 0)."""
    a_c = jnp.clip(a, lo, hi)
    a_c = jnp.where(a_c == lo, 0.0, a_c)
    a_c = jnp.where(a_c == hi, 0.0, a_c)
    a_c = jnp.where(a_c > 0.0, 1.0, a_c)
    return a_c


def st_dagcn_kernel(x_ref, a_ref, wg_ref, bg_ref, wr_ref, br_ref, wt_ref, bt_ref,
                    prelu_ref, out_ref, hp_ref, *,
                    T, V, C_in, C_out, K, S, kt, pad, boundaries):
    TV = T * V
    bf16 = jnp.bfloat16

    # ---- input: channels-first (C_in, T*V) lane-dense load; one tiny in-kernel transpose ----
    x_cf = x_ref[0]                                       # (C_in, T*V)  f32
    x_cl = jnp.transpose(x_cf).astype(bf16)               # (T*V, C_in)  bf16 matmul operand
    A_t = a_ref[0]                                        # (T, W, K*V)  pre-transposed adjacency

    # ---- residual branch: 1x1 conv (in_channels != out_channels case) ----
    res = jnp.dot(x_cl, wr_ref[...], preferred_element_type=jnp.float32) + br_ref[...]
    # res: (T*V, C_out) f32

    # ---- S disentangled graph-conv branches; K relations fused into one contraction ----
    x_a = jnp.zeros((T, V, C_out), jnp.float32)
    for j in range(S):
        # clip in f32 (exact boundary semantics); binary {0,1} result is exact in bf16
        a_c = _clip_adj(A_t, boundaries[j], boundaries[j + 1]).astype(bf16)      # (T, W, K*V)
        # 1x1 conv: C_in -> K*C_out  (output channel index = k*C_out + c, as in torch .view)
        feat = jnp.dot(x_cl, wg_ref[j], preferred_element_type=jnp.float32) + bg_ref[j]
        # rearrange to (T, K*V, C_out): contraction index k*V + v, lane dim (C_out) untouched
        feat_kv = jnp.concatenate(
            [feat[:, k * C_out:(k + 1) * C_out].reshape(T, V, C_out) for k in range(K)],
            axis=1).astype(bf16)                                                  # (T, K*V, C_out)
        # x_a[t, w, c] += sum_{k,v} A_clip[k, t, v, w] * feat[t, v, k, c]
        x_a = x_a + jnp.einsum('twx,txc->twc', a_c, feat_kv,
                               preferred_element_type=jnp.float32)

    # ---- tcn: PReLU -> Conv2d((kt, 1), stride 1, pad ((kt-1)//2, 0)); kt taps fused ----
    a1 = prelu_ref[0]
    h = jnp.where(x_a >= 0.0, x_a, a1 * x_a)              # (T, V, C_out) f32

    if pad > 0:
        hp_ref[0:pad] = jnp.zeros((pad, V, C_out), jnp.float32)
        hp_ref[pad + T:pad + T + pad] = jnp.zeros((pad, V, C_out), jnp.float32)
    hp_ref[pad:pad + T] = h

    stacked = jnp.concatenate([hp_ref[dt:dt + T] for dt in range(kt)], axis=-1)   # (T, V, kt*C)
    stacked = stacked.reshape(TV, kt * C_out).astype(bf16)
    wt_flat = wt_ref[...].reshape(kt * C_out, C_out)                               # bf16
    y = jnp.dot(stacked, wt_flat, preferred_element_type=jnp.float32) + bt_ref[...]

    # ---- residual add + final PReLU; channels-first lane-dense store (last dim = T*V) ----
    out = y + res                                          # (T*V, C_out) f32
    a2 = prelu_ref[1]
    out = jnp.where(out >= 0.0, out, a2 * out)
    out_ref[0] = jnp.transpose(out).astype(out_ref.dtype)  # (C_out, T*V)


def st_dagcn_forward(x_ncthw, A, params, *, split, kernel_size):
    """x_ncthw: (N, C_in, T, V) like PyTorch NCHW.  A: (N, K, T, V, V).  Returns ((N, C_out, T, V), A)."""
    wg, bg, wr, br, wt, bt, prelu = params
    N, C_in, T, V = x_ncthw.shape
    kt, K = kernel_size
    pad = (kt - 1) // 2
    S = len(split) + 1
    C_out = wr.shape[1]
    TV = T * V
    boundaries = tuple([0.0] + sorted(split) + [1e10])

    # Lane-dense channels-first input: pure reshape, no HBM transpose of x.
    x_cf = x_ncthw.reshape(N, C_in, TV).astype(jnp.float32)
    # Pre-transpose A once so the in-kernel contraction runs over its last (lane) dim and the
    # K relations fuse into the contraction:  A_t[n, t, w, k*V + v] = A[n, k, t, v, w].
    A_t = jnp.transpose(A, (0, 2, 4, 1, 3)).reshape(N, T, V, K * V).astype(jnp.float32)

    # bf16 matmul operands (f32 accumulation inside the kernel); biases stay f32.
    wg_bf = wg.astype(jnp.bfloat16)
    wr_bf = wr.astype(jnp.bfloat16)
    wt_bf = wt.astype(jnp.bfloat16)

    kernel = functools.partial(
        st_dagcn_kernel, T=T, V=V, C_in=C_in, C_out=C_out, K=K, S=S,
        kt=kt, pad=pad, boundaries=boundaries)

    out = pl.pallas_call(
        kernel,
        out_shape=jax.ShapeDtypeStruct((N, C_out, TV), jnp.float32),
        grid_spec=pltpu.PrefetchScalarGridSpec(
            num_scalar_prefetch=0,
            grid=(N,),
            in_specs=[
                pl.BlockSpec((1, C_in, TV), lambda n: (n, 0, 0)),
                pl.BlockSpec((1, T, V, K * V), lambda n: (n, 0, 0, 0)),
                pl.BlockSpec((S, C_in, K * C_out), lambda n: (0, 0, 0)),
                pl.BlockSpec((S, 1, K * C_out), lambda n: (0, 0, 0)),
                pl.BlockSpec((C_in, C_out), lambda n: (0, 0)),
                pl.BlockSpec((1, C_out), lambda n: (0, 0)),
                pl.BlockSpec((kt, C_out, C_out), lambda n: (0, 0, 0)),
                pl.BlockSpec((1, C_out), lambda n: (0, 0)),
                pl.BlockSpec(memory_space=pltpu.MemorySpace.SMEM),   # PReLU params (2,)
            ],
            out_specs=pl.BlockSpec((1, C_out, TV), lambda n: (n, 0, 0)),
            scratch_shapes=[pltpu.VMEM((T + 2 * pad, V, C_out), jnp.float32)],
        ),
        # Independent batch samples: "parallel" lets v7x shard the N loop across its 2 TCs.
        # (For large N, block several samples per grid step to amortize per-step overhead.)
        compiler_params=pltpu.CompilerParams(dimension_semantics=("parallel",)),
    )(x_cf, A_t, wg_bf, bg, wr_bf, br, wt_bf, bt, prelu)

    return out.reshape(N, C_out, T, V), A


def reference_forward(x_ncthw, A, params, *, split, kernel_size):
    """Pure-JAX f32 reference mirroring the PyTorch forward (same parameter conventions)."""
    wg, bg, wr, br, wt, bt, prelu = params
    N, C_in, T, V = x_ncthw.shape
    kt, K = kernel_size
    pad = (kt - 1) // 2
    S = len(split) + 1
    C_out = wr.shape[1]
    boundaries = [0.0] + sorted(split) + [1e10]

    x = jnp.transpose(x_ncthw, (0, 2, 3, 1)).astype(jnp.float32)    # (N, T, V, C_in)
    res = jnp.einsum('ntvi,io->ntvo', x, wr) + br.reshape(1, 1, 1, C_out)

    x_a = jnp.zeros((N, T, V, C_out), jnp.float32)
    for j in range(S):
        a_c = _clip_adj(A, boundaries[j], boundaries[j + 1])        # (N, K, T, V, V)
        feat = jnp.einsum('ntvi,ic->ntvc', x, wg[j]) + bg[j].reshape(1, 1, 1, K * C_out)
        feat = feat.reshape(N, T, V, K, C_out)
        x_a = x_a + jnp.einsum('ntvkc,nktvw->ntwc', feat, a_c)

    a1, a2 = prelu[0], prelu[1]
    h = jnp.where(x_a >= 0.0, x_a, a1 * x_a)
    hp = jnp.pad(h, ((0, 0), (pad, pad), (0, 0), (0, 0)))
    y = jnp.zeros((N, T, V, C_out), jnp.float32) + bt.reshape(1, 1, 1, C_out)
    for dt in range(kt):
        y = y + jnp.einsum('ntvc,cd->ntvd', hp[:, dt:dt + T], wt[dt])
    out = y + res
    out = jnp.where(out >= 0.0, out, a2 * out)
    return jnp.transpose(out, (0, 3, 1, 2))


if __name__ == "__main__":
    # Module configuration (small, consistent with st_dagcn(in, out, kernel_size=(3, 2), split=[...])).
    N, C_in, C_out, T, V = 2, 4, 32, 8, 16
    kernel_size = (3, 2)          # (temporal kernel, spatial/relation kernel K)
    K = kernel_size[1]
    split = [0.5, 1.0]            # -> S = 3 disentangled relation groups
    S = len(split) + 1
    kt = kernel_size[0]

    key = jax.random.PRNGKey(0)
    ks = jax.random.split(key, 9)
    scale = 0.1
    # Deterministic synthetic parameters (shapes follow the PyTorch module __init__).
    wg = jax.random.normal(ks[0], (S, C_in, K * C_out), jnp.float32) * scale   # S x Conv2d(C_in, K*C_out, 1x1)
    bg = jax.random.normal(ks[1], (S, 1, K * C_out), jnp.float32) * scale
    wr = jax.random.normal(ks[2], (C_in, C_out), jnp.float32) * scale          # residual Conv2d 1x1
    br = jax.random.normal(ks[3], (1, C_out), jnp.float32) * scale
    wt = jax.random.normal(ks[4], (kt, C_out, C_out), jnp.float32) * scale     # tcn Conv2d (kt, 1)
    bt = jax.random.normal(ks[5], (1, C_out), jnp.float32) * scale
    prelu = jnp.array([0.25, 0.25], jnp.float32)                               # PyTorch PReLU default init
    params = (wg, bg, wr, br, wt, bt, prelu)

    # Inputs: x in PyTorch NCHW layout (N, C_in, T, V); A is a non-negative "distance" adjacency.
    x = jax.random.normal(ks[6], (N, C_in, T, V), jnp.float32)
    A = jax.random.uniform(ks[7], (N, K, T, V, V), minval=0.0, maxval=1.5, dtype=jnp.float32)

    out, A_out = st_dagcn_forward(x, A, params, split=split, kernel_size=kernel_size)
    out = jax.block_until_ready(out)

    ref = reference_forward(x, A, params, split=split, kernel_size=kernel_size)
    ref = jax.block_until_ready(ref)

    # Kernel uses bf16 MXU operands with f32 accumulation; reference is pure f32, so the
    # tolerance is slightly wider than a pure-f32 comparison would need.
    max_err = float(jnp.max(jnp.abs(out - ref)))
    if not (max_err < 3e-2):
        raise AssertionError(f"Pallas kernel mismatch, max abs err = {max_err}")
    print("KERNEL_OK")
</pallas_src>

<mosaic_0001>
module attributes {stable_mosaic.version = 11 : i64} {
  func.func @st_dagcn_kernel(%arg0: i32, %arg1: memref<1x4x128xf32, #tpu.memory_space<vmem>>, %arg2: memref<1x8x16x32xf32, #tpu.memory_space<vmem>>, %arg3: memref<3x4x64xbf16, #tpu.memory_space<vmem>>, %arg4: memref<3x1x64xf32, #tpu.memory_space<vmem>>, %arg5: memref<4x32xbf16, #tpu.memory_space<vmem>>, %arg6: memref<1x32xf32, #tpu.memory_space<vmem>>, %arg7: memref<3x32x32xbf16, #tpu.memory_space<vmem>>, %arg8: memref<1x32xf32, #tpu.memory_space<vmem>>, %arg9: memref<2xf32, #tpu.memory_space<smem>>, %arg10: memref<1x32x128xf32, #tpu.memory_space<vmem>>, %arg11: memref<10x16x32xf32, #tpu.memory_space<vmem>>) attributes {dimension_semantics = [#tpu.dimension_semantics<parallel>], iteration_bounds = array<i64: 2>, scalar_prefetch = 0 : i64, scratch_operands = 1 : i64, tpu.core_type = #tpu.core_type<tc>, window_params = [{transform_indices = @transform_0, window_bounds = array<i64: 1, 4, 128>}, {transform_indices = @transform_1, window_bounds = array<i64: 1, 8, 16, 32>}, {pipeline_mode = #tpu.pipeline_mode<synchronous>, transform_indices = @transform_2, window_bounds = array<i64: 3, 4, 64>}, {pipeline_mode = #tpu.pipeline_mode<synchronous>, transform_indices = @transform_3, window_bounds = array<i64: 3, 1, 64>}, {pipeline_mode = #tpu.pipeline_mode<synchronous>, transform_indices = @transform_4, window_bounds = array<i64: 4, 32>}, {pipeline_mode = #tpu.pipeline_mode<synchronous>, transform_indices = @transform_5, window_bounds = array<i64: 1, 32>}, {pipeline_mode = #tpu.pipeline_mode<synchronous>, transform_indices = @transform_6, window_bounds = array<i64: 3, 32, 32>}, {pipeline_mode = #tpu.pipeline_mode<synchronous>, transform_indices = @transform_7, window_bounds = array<i64: 1, 32>}, {transform_indices = @transform_8, window_bounds = array<i64: 2>}, {transform_indices = @transform_9, window_bounds = array<i64: 1, 32, 128>}]} {
    %c0 = arith.constant 0 : index
    %c0_0 = arith.constant 0 : index
    %c0_1 = arith.constant 0 : index
    %0 = vector.load %arg1[%c0, %c0_0, %c0_1] : memref<1x4x128xf32, #tpu.memory_space<vmem>>, vector<1x4x128xf32>
    %1 = vector.shape_cast %0 : vector<1x4x128xf32> to vector<4x128xf32>
    %2 = tpu.transpose %1, [1, 0] : vector<4x128xf32> -> vector<128x4xf32>
    %3 = arith.truncf %2 : vector<128x4xf32> to vector<128x4xbf16>
    %c0_2 = arith.constant 0 : index
    %c0_3 = arith.constant 0 : index
    %c0_4 = arith.constant 0 : index
    %c0_5 = arith.constant 0 : index
    %4 = vector.load %arg2[%c0_2, %c0_3, %c0_4, %c0_5] : memref<1x8x16x32xf32, #tpu.memory_space<vmem>>, vector<1x8x16x32xf32>
    %5 = vector.shape_cast %4 : vector<1x8x16x32xf32> to vector<8x16x32xf32>
    %c0_6 = arith.constant 0 : index
    %c0_7 = arith.constant 0 : index
    %6 = vector.load %arg5[%c0_6, %c0_7] : memref<4x32xbf16, #tpu.memory_space<vmem>>, vector<4x32xbf16>
    %cst = arith.constant dense<0.000000e+00> : vector<128x32xf32>
    %7 = tpu.matmul %3, %6, %cst {dimension_numbers = #tpu.dot_dimension_numbers<[1], [0], [0], [1], [0, 0, 1, 1], [], []>} : vector<128x4xbf16>, vector<4x32xbf16>, vector<128x32xf32> -> vector<128x32xf32>
    %c0_8 = arith.constant 0 : index
    %c0_9 = arith.constant 0 : index
    %8 = vector.load %arg6[%c0_8, %c0_9] : memref<1x32xf32, #tpu.memory_space<vmem>>, vector<1x32xf32>
    %9 = vector.broadcast %8 : vector<1x32xf32> to vector<128x32xf32>
    %10 = arith.addf %7, %9 : vector<128x32xf32>
    %cst_10 = arith.constant 0.000000e+00 : f32
    %11 = vector.broadcast %cst_10 : f32 to vector<8x16x32xf32>
    %cst_11 = arith.constant 0.000000e+00 : f32
    %cst_12 = arith.constant 5.000000e-01 : f32
    %12 = vector.broadcast %cst_11 : f32 to vector<8x16x32xf32>
    %13 = arith.maximumf %12, %5 : vector<8x16x32xf32>
    %14 = vector.broadcast %cst_12 : f32 to vector<8x16x32xf32>
    %15 = arith.minimumf %14, %13 : vector<8x16x32xf32>
    %cst_13 = arith.constant 0.000000e+00 : f32
    %16 = vector.broadcast %cst_13 : f32 to vector<8x16x32xf32>
    %17 = arith.cmpf oeq, %15, %16 : vector<8x16x32xf32>
    %cst_14 = arith.constant 0.000000e+00 : f32
    %18 = vector.broadcast %cst_14 : f32 to vector<8x16x32xf32>
    %19 = arith.select %17, %18, %15 : vector<8x16x32xi1>, vector<8x16x32xf32>
    %cst_15 = arith.constant 5.000000e-01 : f32
    %20 = vector.broadcast %cst_15 : f32 to vector<8x16x32xf32>
    %21 = arith.cmpf oeq, %19, %20 : vector<8x16x32xf32>
    %cst_16 = arith.constant 0.000000e+00 : f32
    %22 = vector.broadcast %cst_16 : f32 to vector<8x16x32xf32>
    %23 = arith.select %21, %22, %19 : vector<8x16x32xi1>, vector<8x16x32xf32>
    %cst_17 = arith.constant 0.000000e+00 : f32
    %24 = vector.broadcast %cst_17 : f32 to vector<8x16x32xf32>
    %25 = arith.cmpf ogt, %23, %24 : vector<8x16x32xf32>
    %cst_18 = arith.constant 1.000000e+00 : f32
    %26 = vector.broadcast %cst_18 : f32 to vector<8x16x32xf32>
    %27 = arith.select %25, %26, %23 : vector<8x16x32xi1>, vector<8x16x32xf32>
    %28 = arith.truncf %27 : vector<8x16x32xf32> to vector<8x16x32xbf16>
    %c0_19 = arith.constant 0 : index
    %c0_20 = arith.constant 0 : index
    %c0_21 = arith.constant 0 : index
    %29 = vector.load %arg3[%c0_19, %c0_20, %c0_21] : memref<3x4x64xbf16, #tpu.memory_space<vmem>>, vector<1x4x64xbf16>
    %30 = vector.shape_cast %29 : vector<1x4x64xbf16> to vector<4x64xbf16>
    %cst_22 = arith.constant dense<0.000000e+00> : vector<128x64xf32>
    %31 = tpu.matmul %3, %30, %cst_22 {dimension_numbers = #tpu.dot_dimension_numbers<[1], [0], [0], [1], [0, 0, 1, 1], [], []>} : vector<128x4xbf16>, vector<4x64xbf16>, vector<128x64xf32> -> vector<128x64xf32>
    %c0_23 = arith.constant 0 : index
    %c0_24 = arith.constant 0 : index
    %c0_25 = arith.constant 0 : index
    %32 = vector.load %arg4[%c0_23, %c0_24, %c0_25] : memref<3x1x64xf32, #tpu.memory_space<vmem>>, vector<1x1x64xf32>
    %33 = vector.shape_cast %32 : vector<1x1x64xf32> to vector<1x64xf32>
    %34 = vector.broadcast %33 : vector<1x64xf32> to vector<128x64xf32>
    %35 = arith.addf %31, %34 : vector<128x64xf32>
    %36 = vector.extract_strided_slice %35 {offsets = [0, 0], sizes = [128, 32], strides = [1, 1]} : vector<128x64xf32> to vector<128x32xf32>
    %37 = vector.shape_cast %36 : vector<128x32xf32> to vector<8x16x32xf32>
    %38 = vector.extract_strided_slice %35 {offsets = [0, 32], sizes = [128, 32], strides = [1, 1]} : vector<128x64xf32> to vector<128x32xf32>
    %39 = vector.shape_cast %38 : vector<128x32xf32> to vector<8x16x32xf32>
    %40 = tpu.concatenate %37, %39 in 1 : vector<8x16x32xf32>, vector<8x16x32xf32> -> vector<8x32x32xf32>
    %41 = arith.truncf %40 : vector<8x32x32xf32> to vector<8x32x32xbf16>
    "tpu.trace_start"() <{level = 10 : i32, message = "twx,txc->twc"}> : () -> ()
    %cst_26 = arith.constant dense<0.000000e+00> : vector<8x16x32xf32>
    %42 = tpu.matmul %28, %41, %cst_26 {dimension_numbers = #tpu.dot_dimension_numbers<[2], [1], [1], [2], [0, 0, 0, 1, 1, 2], [0], [0]>} : vector<8x16x32xbf16>, vector<8x32x32xbf16>, vector<8x16x32xf32> -> vector<8x16x32xf32>
    "tpu.trace_stop"() : () -> ()
    %43 = arith.addf %11, %42 : vector<8x16x32xf32>
    %cst_27 = arith.constant 5.000000e-01 : f32
    %cst_28 = arith.constant 1.000000e+00 : f32
    %44 = vector.broadcast %cst_27 : f32 to vector<8x16x32xf32>
    %45 = arith.maximumf %44, %5 : vector<8x16x32xf32>
    %46 = vector.broadcast %cst_28 : f32 to vector<8x16x32xf32>
    %47 = arith.minimumf %46, %45 : vector<8x16x32xf32>
    %cst_29 = arith.constant 5.000000e-01 : f32
    %48 = vector.broadcast %cst_29 : f32 to vector<8x16x32xf32>
    %49 = arith.cmpf oeq, %47, %48 : vector<8x16x32xf32>
    %cst_30 = arith.constant 0.000000e+00 : f32
    %50 = vector.broadcast %cst_30 : f32 to vector<8x16x32xf32>
    %51 = arith.select %49, %50, %47 : vector<8x16x32xi1>, vector<8x16x32xf32>
    %cst_31 = arith.constant 1.000000e+00 : f32
    %52 = vector.broadcast %cst_31 : f32 to vector<8x16x32xf32>
    %53 = arith.cmpf oeq, %51, %52 : vector<8x16x32xf32>
    %cst_32 = arith.constant 0.000000e+00 : f32
    %54 = vector.broadcast %cst_32 : f32 to vector<8x16x32xf32>
    %55 = arith.select %53, %54, %51 : vector<8x16x32xi1>, vector<8x16x32xf32>
    %cst_33 = arith.constant 0.000000e+00 : f32
    %56 = vector.broadcast %cst_33 : f32 to vector<8x16x32xf32>
    %57 = arith.cmpf ogt, %55, %56 : vector<8x16x32xf32>
    %cst_34 = arith.constant 1.000000e+00 : f32
    %58 = vector.broadcast %cst_34 : f32 to vector<8x16x32xf32>
    %59 = arith.select %57, %58, %55 : vector<8x16x32xi1>, vector<8x16x32xf32>
    %60 = arith.truncf %59 : vector<8x16x32xf32> to vector<8x16x32xbf16>
    %c1 = arith.constant 1 : index
    %c0_35 = arith.constant 0 : index
    %c0_36 = arith.constant 0 : index
    %61 = vector.load %arg3[%c1, %c0_35, %c0_36] : memref<3x4x64xbf16, #tpu.memory_space<vmem>>, vector<1x4x64xbf16>
    %62 = vector.shape_cast %61 : vector<1x4x64xbf16> to vector<4x64xbf16>
    %cst_37 = arith.constant dense<0.000000e+00> : vector<128x64xf32>
    %63 = tpu.matmul %3, %62, %cst_37 {dimension_numbers = #tpu.dot_dimension_numbers<[1], [0], [0], [1], [0, 0, 1, 1], [], []>} : vector<128x4xbf16>, vector<4x64xbf16>, vector<128x64xf32> -> vector<128x64xf32>
    %c1_38 = arith.constant 1 : index
    %c0_39 = arith.constant 0 : index
    %c0_40 = arith.constant 0 : index
    %64 = vector.load %arg4[%c1_38, %c0_39, %c0_40] : memref<3x1x64xf32, #tpu.memory_space<vmem>>, vector<1x1x64xf32>
    %65 = vector.shape_cast %64 : vector<1x1x64xf32> to vector<1x64xf32>
    %66 = vector.broadcast %65 : vector<1x64xf32> to vector<128x64xf32>
    %67 = arith.addf %63, %66 : vector<128x64xf32>
    %68 = vector.extract_strided_slice %67 {offsets = [0, 0], sizes = [128, 32], strides = [1, 1]} : vector<128x64xf32> to vector<128x32xf32>
    %69 = vector.shape_cast %68 : vector<128x32xf32> to vector<8x16x32xf32>
    %70 = vector.extract_strided_slice %67 {offsets = [0, 32], sizes = [128, 32], strides = [1, 1]} : vector<128x64xf32> to vector<128x32xf32>
    %71 = vector.shape_cast %70 : vector<128x32xf32> to vector<8x16x32xf32>
    %72 = tpu.concatenate %69, %71 in 1 : vector<8x16x32xf32>, vector<8x16x32xf32> -> vector<8x32x32xf32>
    %73 = arith.truncf %72 : vector<8x32x32xf32> to vector<8x32x32xbf16>
    "tpu.trace_start"() <{level = 10 : i32, message = "twx,txc->twc"}> : () -> ()
    %cst_41 = arith.constant dense<0.000000e+00> : vector<8x16x32xf32>
    %74 = tpu.matmul %60, %73, %cst_41 {dimension_numbers = #tpu.dot_dimension_numbers<[2], [1], [1], [2], [0, 0, 0, 1, 1, 2], [0], [0]>} : vector<8x16x32xbf16>, vector<8x32x32xbf16>, vector<8x16x32xf32> -> vector<8x16x32xf32>
    "tpu.trace_stop"() : () -> ()
    %75 = arith.addf %43, %74 : vector<8x16x32xf32>
    %cst_42 = arith.constant 1.000000e+00 : f32
    %cst_43 = arith.constant 1.000000e+10 : f32
    %76 = vector.broadcast %cst_42 : f32 to vector<8x16x32xf32>
    %77 = arith.maximumf %76, %5 : vector<8x16x32xf32>
    %78 = vector.broadcast %cst_43 : f32 to vector<8x16x32xf32>
    %79 = arith.minimumf %78, %77 : vector<8x16x32xf32>
    %cst_44 = arith.constant 1.000000e+00 : f32
    %80 = vector.broadcast %cst_44 : f32 to vector<8x16x32xf32>
    %81 = arith.cmpf oeq, %79, %80 : vector<8x16x32xf32>
    %cst_45 = arith.constant 0.000000e+00 : f32
    %82 = vector.broadcast %cst_45 : f32 to vector<8x16x32xf32>
    %83 = arith.select %81, %82, %79 : vector<8x16x32xi1>, vector<8x16x32xf32>
    %cst_46 = arith.constant 1.000000e+10 : f32
    %84 = vector.broadcast %cst_46 : f32 to vector<8x16x32xf32>
    %85 = arith.cmpf oeq, %83, %84 : vector<8x16x32xf32>
    %cst_47 = arith.constant 0.000000e+00 : f32
    %86 = vector.broadcast %cst_47 : f32 to vector<8x16x32xf32>
    %87 = arith.select %85, %86, %83 : vector<8x16x32xi1>, vector<8x16x32xf32>
    %cst_48 = arith.constant 0.000000e+00 : f32
    %88 = vector.broadcast %cst_48 : f32 to vector<8x16x32xf32>
    %89 = arith.cmpf ogt, %87, %88 : vector<8x16x32xf32>
    %cst_49 = arith.constant 1.000000e+00 : f32
    %90 = vector.broadcast %cst_49 : f32 to vector<8x16x32xf32>
    %91 = arith.select %89, %90, %87 : vector<8x16x32xi1>, vector<8x16x32xf32>
    %92 = arith.truncf %91 : vector<8x16x32xf32> to vector<8x16x32xbf16>
    %c2 = arith.constant 2 : index
    %c0_50 = arith.constant 0 : index
    %c0_51 = arith.constant 0 : index
    %93 = vector.load %arg3[%c2, %c0_50, %c0_51] : memref<3x4x64xbf16, #tpu.memory_space<vmem>>, vector<1x4x64xbf16>
    %94 = vector.shape_cast %93 : vector<1x4x64xbf16> to vector<4x64xbf16>
    %cst_52 = arith.constant dense<0.000000e+00> : vector<128x64xf32>
    %95 = tpu.matmul %3, %94, %cst_52 {dimension_numbers = #tpu.dot_dimension_numbers<[1], [0], [0], [1], [0, 0, 1, 1], [], []>} : vector<128x4xbf16>, vector<4x64xbf16>, vector<128x64xf32> -> vector<128x64xf32>
    %c2_53 = arith.constant 2 : index
    %c0_54 = arith.constant 0 : index
    %c0_55 = arith.constant 0 : index
    %96 = vector.load %arg4[%c2_53, %c0_54, %c0_55] : memref<3x1x64xf32, #tpu.memory_space<vmem>>, vector<1x1x64xf32>
    %97 = vector.shape_cast %96 : vector<1x1x64xf32> to vector<1x64xf32>
    %98 = vector.broadcast %97 : vector<1x64xf32> to vector<128x64xf32>
    %99 = arith.addf %95, %98 : vector<128x64xf32>
    %100 = vector.extract_strided_slice %99 {offsets = [0, 0], sizes = [128, 32], strides = [1, 1]} : vector<128x64xf32> to vector<128x32xf32>
    %101 = vector.shape_cast %100 : vector<128x32xf32> to vector<8x16x32xf32>
    %102 = vector.extract_strided_slice %99 {offsets = [0, 32], sizes = [128, 32], strides = [1, 1]} : vector<128x64xf32> to vector<128x32xf32>
    %103 = vector.shape_cast %102 : vector<128x32xf32> to vector<8x16x32xf32>
    %104 = tpu.concatenate %101, %103 in 1 : vector<8x16x32xf32>, vector<8x16x32xf32> -> vector<8x32x32xf32>
    %105 = arith.truncf %104 : vector<8x32x32xf32> to vector<8x32x32xbf16>
    "tpu.trace_start"() <{level = 10 : i32, message = "twx,txc->twc"}> : () -> ()
    %cst_56 = arith.constant dense<0.000000e+00> : vector<8x16x32xf32>
    %106 = tpu.matmul %92, %105, %cst_56 {dimension_numbers = #tpu.dot_dimension_numbers<[2], [1], [1], [2], [0, 0, 0, 1, 1, 2], [0], [0]>} : vector<8x16x32xbf16>, vector<8x32x32xbf16>, vector<8x16x32xf32> -> vector<8x16x32xf32>
    "tpu.trace_stop"() : () -> ()
    %107 = arith.addf %75, %106 : vector<8x16x32xf32>
    %c0_57 = arith.constant 0 : index
    %108 = memref.load %arg9[%c0_57] : memref<2xf32, #tpu.memory_space<smem>>
    %cst_58 = arith.constant 0.000000e+00 : f32
    %109 = vector.broadcast %cst_58 : f32 to vector<8x16x32xf32>
    %110 = arith.cmpf oge, %107, %109 : vector<8x16x32xf32>
    %111 = vector.broadcast %108 : f32 to vector<8x16x32xf32>
    %112 = arith.mulf %111, %107 : vector<8x16x32xf32>
    %113 = arith.select %110, %107, %112 : vector<8x16x32xi1>, vector<8x16x32xf32>
    %cst_59 = arith.constant 0.000000e+00 : f32
    %114 = vector.broadcast %cst_59 : f32 to vector<1x16x32xf32>
    %c0_60 = arith.constant 0 : index
    %c0_61 = arith.constant 0 : index
    %c0_62 = arith.constant 0 : index
    %115 = vector.load %arg11[%c0_60, %c0_61, %c0_62] : memref<10x16x32xf32, #tpu.memory_space<vmem>>, vector<1x16x32xf32>
    tpu.vector_store %arg11[%c0_60, %c0_61, %c0_62], %114 {strides = array<i32>} : memref<10x16x32xf32, #tpu.memory_space<vmem>>, vector<1x16x32xf32>,
    %cst_63 = arith.constant 0.000000e+00 : f32
    %116 = vector.broadcast %cst_63 : f32 to vector<1x16x32xf32>
    %c9 = arith.constant 9 : index
    %c0_64 = arith.constant 0 : index
    %c0_65 = arith.constant 0 : index
    %117 = vector.load %arg11[%c9, %c0_64, %c0_65] : memref<10x16x32xf32, #tpu.memory_space<vmem>>, vector<1x16x32xf32>
    tpu.vector_store %arg11[%c9, %c0_64, %c0_65], %116 {strides = array<i32>} : memref<10x16x32xf32, #tpu.memory_space<vmem>>, vector<1x16x32xf32>,
    %c1_66 = arith.constant 1 : index
    %c0_67 = arith.constant 0 : index
    %c0_68 = arith.constant 0 : index
    %118 = vector.load %arg11[%c1_66, %c0_67, %c0_68] : memref<10x16x32xf32, #tpu.memory_space<vmem>>, vector<8x16x32xf32>
    tpu.vector_store %arg11[%c1_66, %c0_67, %c0_68], %113 {strides = array<i32>} : memref<10x16x32xf32, #tpu.memory_space<vmem>>, vector<8x16x32xf32>,
    %c0_69 = arith.constant 0 : index
    %c0_70 = arith.constant 0 : index
    %c0_71 = arith.constant 0 : index
    %119 = vector.load %arg11[%c0_69, %c0_70, %c0_71] : memref<10x16x32xf32, #tpu.memory_space<vmem>>, vector<8x16x32xf32>
    %c1_72 = arith.constant 1 : index
    %c0_73 = arith.constant 0 : index
    %c0_74 = arith.constant 0 : index
    %120 = vector.load %arg11[%c1_72, %c0_73, %c0_74] : memref<10x16x32xf32, #tpu.memory_space<vmem>>, vector<8x16x32xf32>
    %c2_75 = arith.constant 2 : index
    %c0_76 = arith.constant 0 : index
    %c0_77 = arith.constant 0 : index
    %121 = vector.load %arg11[%c2_75, %c0_76, %c0_77] : memref<10x16x32xf32, #tpu.memory_space<vmem>>, vector<8x16x32xf32>
    %122 = tpu.concatenate %119, %120, %121 in 2 : vector<8x16x32xf32>, vector<8x16x32xf32>, vector<8x16x32xf32> -> vector<8x16x96xf32>
    %123 = vector.shape_cast %122 : vector<8x16x96xf32> to vector<128x96xf32>
    %124 = arith.truncf %123 : vector<128x96xf32> to vector<128x96xbf16>
    %c0_78 = arith.constant 0 : index
    %c0_79 = arith.constant 0 : index
    %c0_80 = arith.constant 0 : index
    %125 = vector.load %arg7[%c0_78, %c0_79, %c0_80] : memref<3x32x32xbf16, #tpu.memory_space<vmem>>, vector<3x32x32xbf16>
    %126 = vector.shape_cast %125 : vector<3x32x32xbf16> to vector<96x32xbf16>
    %cst_81 = arith.constant dense<0.000000e+00> : vector<128x32xf32>
    %127 = tpu.matmul %124, %126, %cst_81 {dimension_numbers = #tpu.dot_dimension_numbers<[1], [0], [0], [1], [0, 0, 1, 1], [], []>} : vector<128x96xbf16>, vector<96x32xbf16>, vector<128x32xf32> -> vector<128x32xf32>
    %c0_82 = arith.constant 0 : index
    %c0_83 = arith.constant 0 : index
    %128 = vector.load %arg8[%c0_82, %c0_83] : memref<1x32xf32, #tpu.memory_space<vmem>>, vector<1x32xf32>
    %129 = vector.broadcast %128 : vector<1x32xf32> to vector<128x32xf32>
    %130 = arith.addf %127, %129 : vector<128x32xf32>
    %131 = arith.addf %130, %10 : vector<128x32xf32>
    %c1_84 = arith.constant 1 : index
    %132 = memref.load %arg9[%c1_84] : memref<2xf32, #tpu.memory_space<smem>>
    %cst_85 = arith.constant 0.000000e+00 : f32
    %133 = vector.broadcast %cst_85 : f32 to vector<128x32xf32>
    %134 = arith.cmpf oge, %131, %133 : vector<128x32xf32>
    %135 = vector.broadcast %132 : f32 to vector<128x32xf32>
    %136 = arith.mulf %135, %131 : vector<128x32xf32>
    %137 = arith.select %134, %131, %136 : vector<128x32xi1>, vector<128x32xf32>
    %138 = tpu.transpose %137, [1, 0] : vector<128x32xf32> -> vector<32x128xf32>
    %c0_86 = arith.constant 0 : index
    %c0_87 = arith.constant 0 : index
    %c0_88 = arith.constant 0 : index
    %139 = vector.load %arg10[%c0_86, %c0_87, %c0_88] : memref<1x32x128xf32, #tpu.memory_space<vmem>>, vector<1x32x128xf32>
    %140 = vector.shape_cast %139 : vector<1x32x128xf32> to vector<32x128xf32>
    %141 = vector.shape_cast %138 : vector<32x128xf32> to vector<1x32x128xf32>
    tpu.vector_store %arg10[%c0_86, %c0_87, %c0_88], %141 {strides = array<i32>} : memref<1x32x128xf32, #tpu.memory_space<vmem>>, vector<1x32x128xf32>,
    return
  }
  func.func @transform_0(%arg0: i32) -> (i32, i32, i32) {
    %c0_i32 = arith.constant 0 : i32
    %c0_i32_0 = arith.constant 0 : i32
    %c0_i32_1 = arith.constant 0 : i32
    return %arg0, %c0_i32, %c0_i32_0 : i32, i32, i32
  }
  func.func @transform_1(%arg0: i32) -> (i32, i32, i32, i32) {
    %c0_i32 = arith.constant 0 : i32
    %c0_i32_0 = arith.constant 0 : i32
    %c0_i32_1 = arith.constant 0 : i32
    %c0_i32_2 = arith.constant 0 : i32
    return %arg0, %c0_i32, %c0_i32_0, %c0_i32_1 : i32, i32, i32, i32
  }
  func.func @transform_2(%arg0: i32) -> (i32, i32, i32) {
    %c0_i32 = arith.constant 0 : i32
    %c0_i32_0 = arith.constant 0 : i32
    %c0_i32_1 = arith.constant 0 : i32
    %c0_i32_2 = arith.constant 0 : i32
    return %c0_i32, %c0_i32_0, %c0_i32_1 : i32, i32, i32
  }
  func.func @transform_3(%arg0: i32) -> (i32, i32, i32) {
    %c0_i32 = arith.constant 0 : i32
    %c0_i32_0 = arith.constant 0 : i32
    %c0_i32_1 = arith.constant 0 : i32
    %c0_i32_2 = arith.constant 0 : i32
    return %c0_i32, %c0_i32_0, %c0_i32_1 : i32, i32, i32
  }
  func.func @transform_4(%arg0: i32) -> (i32, i32) {
    %c0_i32 = arith.constant 0 : i32
    %c0_i32_0 = arith.constant 0 : i32
    %c0_i32_1 = arith.constant 0 : i32
    return %c0_i32, %c0_i32_0 : i32, i32
  }
  func.func @transform_5(%arg0: i32) -> (i32, i32) {
    %c0_i32 = arith.constant 0 : i32
    %c0_i32_0 = arith.constant 0 : i32
    %c0_i32_1 = arith.constant 0 : i32
    return %c0_i32, %c0_i32_0 : i32, i32
  }
  func.func @transform_6(%arg0: i32) -> (i32, i32, i32) {
    %c0_i32 = arith.constant 0 : i32
    %c0_i32_0 = arith.constant 0 : i32
    %c0_i32_1 = arith.constant 0 : i32
    %c0_i32_2 = arith.constant 0 : i32
    return %c0_i32, %c0_i32_0, %c0_i32_1 : i32, i32, i32
  }
  func.func @transform_7(%arg0: i32) -> (i32, i32) {
    %c0_i32 = arith.constant 0 : i32
    %c0_i32_0 = arith.constant 0 : i32
    %c0_i32_1 = arith.constant 0 : i32
    return %c0_i32, %c0_i32_0 : i32, i32
  }
  func.func @transform_8(%arg0: i32) -> i32 {
    %c0_i32 = arith.constant 0 : i32
    %c0_i32_0 = arith.constant 0 : i32
    return %c0_i32 : i32
  }
  func.func @transform_9(%arg0: i32) -> (i32, i32, i32) {
    %c0_i32 = arith.constant 0 : i32
    %c0_i32_0 = arith.constant 0 : i32
    %c0_i32_1 = arith.constant 0 : i32
    return %arg0, %c0_i32, %c0_i32_0 : i32, i32, i32
  }
}

</mosaic_0001>

<bundles_post_ra>
// kernel: tpu_custom_call.1
= control target key start
LH: loop header
LB: loop body
LE: loop exit
PB: predicated region body
PF: predicated region fallthrough
CT: control target
= control target key end

     0   :  { %s5652_s0 = inlined_call_operand.hbm [shape: f32[2,4,128], index: 0, kind: input, shape index: {}]   ;;  %s5653_s1 = inlined_call_operand.hbm [shape: f32[2,8,16,32], index: 1, kind: input, shape index: {}]   ;;  %s5654_s2 = inlined_call_operand.vmem [shape: bf16[3,4,64], index: 2, kind: input, shape index: {}]   ;;  %s5655_s3 = inlined_call_operand.vmem [shape: f32[3,1,64], index: 3, kind: input, shape index: {}]   ;;  %s5656_s4 = inlined_call_operand.vmem [shape: bf16[4,32], index: 4, kind: input, shape index: {}]   ;;  %s5657_s5 = inlined_call_operand.vmem [shape: f32[1,32], index: 5, kind: input, shape index: {}]   ;;  %s5658_s6 = inlined_call_operand.hbm [shape: bf16[3,32,32], index: 6, kind: input, shape index: {}]   ;;  %s5659_s7 = inlined_call_operand.vmem [shape: f32[1,32], index: 7, kind: input, shape index: {}]   ;;  %s5660_s8 = inlined_call_operand.vmem [shape: f32[2], index: 8, kind: input, shape index: {}]   ;;  %s5661_s9 = inlined_call_operand.hbm [shape: f32[2,32,128], index: 9, kind: output, shape index: {}]  }
   0x1   :  { %5666 = sst [smem:[#allocation19_spill]] %s5652_s0 }
   0x2   :  { %5667 = sst [smem:[#allocation20_spill]] %s5658_s6 }
   0x3   :  { %5668 = sst [smem:[#allocation21_spill]] %s5660_s8 }
   0x4   :  { %14 = vsyncpa [#allocation4], 0 }
   0x5   :  { %16 = vsyncpa [#allocation4 + $0x1], 0 }
   0x6   :  { %17 = vsyncpa [#allocation8], 0 }
   0x7   :  { %19 = vsyncpa [#allocation8 + $0x1], 0 }
   0x8   :  { %20 = vsyncpa [#allocation6], 0 }
   0x9   :  { %21 = vsyncpa [#allocation5], 0 }
   0xa   :  { %23 = vsyncpa [#allocation5 + $0x1], 0  ;;  %s4535_s30 = smov 0   ;;  %s4537_s10 = smov 0  }
   0xb   :  { %s4539_s11 = smov 0   ;;  %s4541_s12 = smov 0  }
   0xc LB: > { %5669 = sst [smem:[#allocation17_spill]] %s4463_s11  ;;  %s4556_s13 = sadd.s32 4294967295, %s4467_s12   ;;  %s4467_s12 = sphi %s4541_s12, %s5708_s12   ;;  %s4463_s11 = sphi %s4539_s11, %s5705_s11   ;;  %s4459_s10 = sphi %s4537_s10, %s5707_s10   ;;  %s4455_s30 = sphi %s4535_s30, %s5706_s30  }
   0xd   : > { %s3357_s14 = sadd.s32 4294967294, %s4467_s12   ;;  %p49_p0 = scmp.ne.s32.totalorder %s4459_s10, %s4455_s30 }
   0xe   : > { %p5662_p1 = scmp.eq.s32.totalorder %s4556_s13, 0  ;;  %p252_p3 = scmp.eq.s32.totalorder %s3357_s14, 1 }
   0xf   : > { %p3358_p5 = scmp.ge.s32.totalorder %s4467_s12, 1  ;;  %p259_p7 = scmp.lt.s32.totalorder %s4467_s12, 3 }
  0x10   : > { %p4565_p4 = por %p5662_p1, %p49_p0  ;;  %p4570_p6 = por %p252_p3, %p49_p0 }
  0x11   : > { %p4575_p8 = pnand %p3358_p5, %p259_p7  ;;  %s4469_s18 = smov [#allocation9]  }
  0x12   : > { %s5670_s15 = scalar_select %p4565_p4, 1, 0 }
  0x13   : > { %s5671_s16 = scalar_select %p4570_p6, 1, 0 }
  0x14   : > { %s5672_s17 = scalar_select %p4575_p8, 1, 0 }
  0x15   : > { %s283_s19 = sshll.u32 %s4469_s18, 4  ;;  %p4007_p9 = pneg %p4575_p8  ;;  %s284_s19 = int_to_ptr.vmem [resolvable:$true] %s283_s19 }
  0x16   : > { %s5673_s8 = sld [smem:[#allocation21_spill]]  ;;  %s5675_s6 = sld [smem:[#allocation20_spill]] }
  0x17   : > { %p4587_p11 = pnand %p4007_p9, %p5662_p1 }
  0x19   : > { %p4288_p13 = pneg %p4587_p11 }
  0x1c   : > { %s300_s22 = sshll.u32 %s5673_s8, 4  ;;  %s4286_s26 = scalar_lea.hbm %s5675_s6, 768  ;;  %s4591_s22 = int_to_ptr.vmem [resolvable:$true] %s300_s22 }
  0x1d   : > { %p4287_p12 = scmp.ne.s32.totalorder %s5675_s6, %s4286_s26  ;;  %p4293_p5 = scmp.lt.u32.totalorder %s4286_s26, %s5675_s6 }
  0x1f   : > { %p4289_p0 = pnand %p4288_p13, %p4287_p12 }
  0x21   : > { %p4290_p3 = pneg %p4289_p0 }
  0x23   : > { %p4295_p7 = pnand %p4293_p5, %p4290_p3 }
  0x25   : > { %4298 = shalt.err (!%p4295_p7)
}
  0x26   : > { %s4299_s18 = scalar_lea.vmem %s284_s19, 768  ;;  %p4307_p2 = scmp.lt.s32.totalorder %s284_s19, %s284_s19 }
  0x27   : > { %p4300_p9 = scmp.ne.s32.totalorder %s284_s19, %s4299_s18  ;;  %p4308_p6 = scmp.lt.s32.totalorder %s4299_s18, %s4299_s18 }
  0x29   : > { %p4302_p10 = pnand %p4300_p9, %p4288_p13  ;;  %p4309_p4 = por %p4308_p6, %p4307_p2 }
  0x2b   : > { %p4303_p1 = pneg %p4302_p10 }
  0x2d   : > { %p4310_p8 = pnand %p4309_p4, %p4303_p1 }
  0x2f   : > { %4313 = shalt.err (!%p4310_p8)
}
  0x30   : > { %s4470_s20 = smov 64   ;;  %s4471_s21 = smov 4  }
  0x31   : > { %4010 = dma.hbm_to_vmem [thread:$0]  (!%p4587_p11), %s5675_s6, 768, %s284_s19, [#allocation8], %s4470_s20, %s4470_s20, %s4471_s21  }
  0x32   : > { %s4314_s26 = scalar_lea.vmem %s4591_s22, 16  ;;  %p4322_p1 = scmp.lt.s32.totalorder %s4591_s22, %s4591_s22 }
  0x33   : > { %p4315_p12 = scmp.ne.s32.totalorder %s4591_s22, %s4314_s26  ;;  %p4323_p4 = scmp.lt.s32.totalorder %s4314_s26, %s4314_s26 }
  0x35   : > { %p4317_p10 = pnand %p4315_p12, %p4288_p13  ;;  %p4324_p6 = por %p4323_p4, %p4322_p1 }
  0x37   : > { %p4318_p2 = pneg %p4317_p10 }
  0x39   : > { %p4325_p8 = pnand %p4324_p6, %p4318_p2 }
  0x3b   : > { %4328 = shalt.err (!%p4325_p8)
}
  0x3c   : > { %s4472_s27 = smov [#allocation10]   ;;  %s4626_s19 = sadd.s32 1, %s4467_s12  }
  0x3d   : > { %4013 = dma.vmem_to_smem (!%p4587_p11), %s4591_s22, 16, %s4472_s27, [#allocation6]  }
  0x3e   : > { %s36_s28 = sadd.s32 1, %s4463_s11  ;;  %s33_s29 = ssub.s32 %s4467_s12, %s4626_s19 }
  0x3f   : > { %p43_p13 = scmp.ne.s32.totalorder %s4463_s11, %s4459_s10  ;;  %p34_p0 = scmp.eq.s32.totalorder %s33_s29, 0 }
  0x40   : > { %p44_p3 = scmp.eq.s32.totalorder %s4467_s12, 0  ;;  %p5676_p5 = scmp.eq.s32.totalorder %s4556_s13, 1 }
  0x41   : > { %p4027_p9 = scmp.lt.s32.totalorder %s4467_s12, 2  ;;  %s4645_s18 = sand.u32 1, %s4463_s11  }
  0x42   : > { %p4636_p7 = por %p5676_p5, %p43_p13  ;;  %p45_p12 = por %p44_p3, %p43_p13 }
  0x43   : > { %s4642_s14 = scalar_select %p34_p0, %s4463_s11, %s36_s28  }
  0x44   : > { %s3362_s22 = sshll.u32 %s4645_s18, 2  ;;  %s3363_s20 = sshll.u32 %s4467_s12, 6 }
  0x45   : > { %5678 = sst [smem:[#allocation18_spill]] %s4642_s14  ;;  %s5679_s0 = sld [smem:[#allocation19_spill]] }
  0x46   : > { %s315_s26 = scalar_lea.vmem [#allocation3], %s3362_s22  ;;  %p4656_p11 = pnand %p4027_p9, %p45_p12 }
  0x47   : > { %s322_s27 = sshll.u32 %s315_s26, 4  ;;  %s3364_s29 = sshll.u32 %s4645_s18, 7  ;;  %s4654_s27 = int_to_ptr.vmem [resolvable:$true] %s322_s27 }
  0x48   : > { %s312_s8 = scalar_lea.sflag [#allocation4], %s4645_s18  ;;  %p4331_p2 = pneg %p4656_p11 }
  0x4b   : > { %s4652_s25 = scalar_lea.hbm %s5679_s0, %s3363_s20  ;;  %s4334_s24 = scalar_lea.hbm %s5679_s0, 128 }
  0x4c   : > { %s4329_s21 = scalar_lea.hbm %s4652_s25, 64  ;;  %p4335_p6 = scmp.lt.u32.totalorder %s4652_s25, %s5679_s0 }
  0x4d   : > { %p4330_p10 = scmp.ne.s32.totalorder %s4652_s25, %s4329_s21  ;;  %p4336_p8 = scmp.lt.u32.totalorder %s4334_s24, %s4329_s21 }
  0x4e   : > { %p4338_p0 = scmp.lt.u32.totalorder %s4329_s21, %s4652_s25 }
  0x4f   : > { %p4332_p1 = pnand %p4331_p2, %p4330_p10  ;;  %p4337_p13 = por %p4336_p8, %p4335_p6 }
  0x51   : > { %p4333_p4 = pneg %p4332_p1  ;;  %p4339_p3 = por %p4338_p0, %p4337_p13 }
  0x53   : > { %p4340_p5 = pnand %p4339_p3, %p4333_p4 }
  0x55   : > { %4343 = shalt.err (!%p4340_p5)
}
  0x56   : > { %s4344_s6 = scalar_lea.vmem %s4654_s27, 64  ;;  %s4473_s22 = smov [#allocation3]  }
  0x57   : > { %p4345_p9 = scmp.ne.s32.totalorder %s4654_s27, %s4344_s6  ;;  %s4349_s20 = sshll.u32 %s4473_s22, 4  ;;  %s4350_s20 = int_to_ptr.vmem [resolvable:$false] %s4349_s20 }
  0x58   : > { %s4351_s14 = scalar_lea.vmem %s4350_s20, 128  ;;  %p4352_p1 = scmp.lt.s32.totalorder %s4654_s27, %s4350_s20 }
  0x59   : > { %p4347_p12 = pnand %p4345_p9, %p4331_p2  ;;  %p4353_p6 = scmp.lt.s32.totalorder %s4351_s14, %s4344_s6 }
  0x5b   : > { %p4348_p10 = pneg %p4347_p12  ;;  %p4354_p8 = por %p4353_p6, %p4352_p1 }
  0x5d   : > { %p4355_p13 = pnand %p4354_p8, %p4348_p10 }
  0x5f   : > { %4358 = shalt.err (!%p4355_p13)
}
  0x60   : > { %4017 = dma.hbm_to_vmem [thread:$0]  (!%p4656_p11), %s4652_s25, 64, %s4654_s27, %s312_s8  }
  0x61   : > { %s333_s21 = scalar_lea.vmem [#allocation7], %s3364_s29  ;;  %s3458_s26 = sshll.u32 %s4467_s12, 11 }
  0x62   : > { %s340_s24 = sshll.u32 %s333_s21, 4  ;;  %s4696_s20 = scalar_lea.hbm %s5653_s1, %s3458_s26  ;;  %s4690_s24 = int_to_ptr.vmem [resolvable:$true] %s340_s24 }
  0x63   : > { %s5681_s14 = sand.u32 1, %s4467_s12   ;;  %s4359_s11 = scalar_lea.hbm %s4696_s20, 2048 }
  0x64   : > { %s4700_s0 = scalar_lea.sflag [#allocation8], %s5681_s14  ;;  %p4360_p4 = scmp.ne.s32.totalorder %s4696_s20, %s4359_s11 }
  0x65   : > { %s4364_s25 = scalar_lea.hbm %s5653_s1, 4096  ;;  %p4365_p5 = scmp.lt.u32.totalorder %s4696_s20, %s5653_s1 }
  0x66   : > { %p4362_p0 = pnand %p4360_p4, %p4331_p2  ;;  %p4366_p9 = scmp.lt.u32.totalorder %s4364_s25, %s4359_s11 }
  0x67   : > { %p4368_p10 = scmp.lt.u32.totalorder %s4359_s11, %s4696_s20 }
  0x68   : > { %p4363_p3 = pneg %p4362_p0  ;;  %p4367_p12 = por %p4366_p9, %p4365_p5 }
  0x6a   : > { %p4369_p1 = por %p4368_p10, %p4367_p12 }
  0x6c   : > { %p4370_p6 = pnand %p4369_p1, %p4363_p3 }
  0x6e   : > { %4373 = shalt.err (!%p4370_p6)
}
  0x6f   : > { %s4374_s21 = scalar_lea.vmem %s4690_s24, 2048  ;;  %s4474_s26 = smov [#allocation7]  }
  0x70   : > { %p4375_p8 = scmp.ne.s32.totalorder %s4690_s24, %s4374_s21  ;;  %s4379_s22 = sshll.u32 %s4474_s26, 4  ;;  %s4380_s22 = int_to_ptr.vmem [resolvable:$false] %s4379_s22 }
  0x71   : > { %s4381_s6 = scalar_lea.vmem %s4380_s22, 4096  ;;  %p4382_p0 = scmp.lt.s32.totalorder %s4690_s24, %s4380_s22 }
  0x72   : > { %p4377_p13 = pnand %p4375_p8, %p4331_p2  ;;  %p4383_p5 = scmp.lt.s32.totalorder %s4381_s6, %s4374_s21 }
  0x74   : > { %p4378_p4 = pneg %p4377_p13  ;;  %p4384_p9 = por %p4383_p5, %p4382_p0 }
  0x76   : > { %p4385_p12 = pnand %p4384_p9, %p4378_p4 }
  0x78   : > { %4388 = shalt.err (!%p4385_p12)
}
  0x79   : > { %s4475_s11 = smov 128   ;;  %s4476_s14 = smov 8  }
  0x7a   : > { %4020 = dma.hbm_to_vmem [thread:$0]  (!%p4656_p11), %s4696_s20, 2048, %s4690_s24, %s4700_s0, %s4475_s11, %s4475_s11, %s4476_s14  }
  0x7b   : > { %p5682_p2 = scmp.ne.s32.totalorder %s5672_s17, 0 }
  0x7c   : > { %s4729_s8 = sand.u32 (!%p5682_p2), 1, %s4459_s10   ;;  %p5683_p3 = scmp.ne.s32.totalorder (!%p5682_p2), %s5670_s15, 0 }
  0x7d   : > { %352 = sbr.rel (%p5682_p2) target bundleno = 1799 (0x707), region = 56  ;;  %s3368_s18 = sshll.u32 (!%p5682_p2), %s4729_s8, 2 }
  0x7e   : > { %s355_s25 = scalar_lea.sflag (!%p5682_p2), [#allocation4], %s4729_s8  ;;  %s358_s27 = scalar_lea.vmem (!%p5682_p2), [#allocation3], %s3368_s18 }
  0x84   : > { %4434 = dma.done.wait (%p5683_p3), %s355_s25, 64  }
  0x85   : > { %4436 = vsyncadd (%p5683_p3), %s355_s25, 4294967232  ;;  %s363_s0 = sand.u32 1, %s4556_s13   ;;  %s3369_s17 = sshll.u32 %s4729_s8, 7 }
  0x86   : > { %s364_s28 = scalar_lea.sflag [#allocation8], %s363_s0  ;;  %s4739_s24 = scalar_lea.vmem [#allocation7], %s3369_s17 }
  0x87   : > { %4438 = dma.done.wait (%p5683_p3), %s364_s28, 2048  }
  0x88   : > { %4440 = vsyncadd (%p5683_p3), %s364_s28, 4294965248  ;;  %p5684_p11 = scmp.eq.s32.totalorder %s4556_s13, 0 }
  0x8a   : > { %4442 = dma.done.wait (%p5684_p11), [#allocation8], 768   ;;  %p5685_p10 = pmov %p5684_p11 }
  0x8c   : > { %4444 = vsyncadd (%p5685_p10), [#allocation8], 4294966528  ;;  %p5686_p1 = pmov %p5685_p10 }
  0x8e   : > { %4446 = dma.done.wait (%p5686_p1), [#allocation6], 16   ;;  %p5687_p6 = pmov %p5686_p1 }
  0x90   : > { %4448 = vsyncadd (%p5687_p6), [#allocation6], 4294967280 }
  0x91   : > { %380 = sfence }
  0x92   : > { %v417_v0 = vld [vmem:[%s358_s27] sm:$0xf]  ;;  %vm507_vm0 = vcmask 1041408   ;;  %vm482_vm1 = vcmask 31744   ;;  %v4477_v31 = vmov 0.0   ;;  %vm4478_vm2 = vmmov 0  }
  0x93   : > { %418 = vxpose.xlu0.b32.start.end [1/1] (short) %v417_v0, 128  ;;  %v474_v1 = vld [vmem:[%s5656_s4] sm:$0x3]  ;;  %v3391_v3 = vld [vmem:[%s5654_s2 + $0x2] sm:$0x3]  ;;  %vm1258_vm3 = vcmask 261120   ;;  %s4479_s25 = smov 96  }
  0x94   : > { %3988 = vmatprep.subr.msk.bf16.mxu0 %vm507_vm0, %v474_v1  ;;  %v509_v2 = vsel %vm507_vm0, %v474_v1, 0  ;;  %3989 = vmatprep.subr.msk.bf16.mxu1 %vm507_vm0, %v474_v1  ;;  %v744_v4 = vld [vmem:[%s5654_s2] sm:$0x3]  ;;  %v1079_v11 = vsel %vm507_vm0, %v3391_v3, 0  ;;  %2707 = vst.msk [vmem:[#allocation2] sm:$0xff] %vm1258_vm3, %v4477_v31  ;;  %2708 = vst.msk [vmem:[#allocation2 + $0x8] sm:$0xff] %vm1258_vm3, %v4477_v31 }
  0x95   : > { %3583 = vmatpush3.bf16.msra.mxu0 %v509_v2  ;;  %3875 = vmatpush3.bf16.msra.mxu1 %v509_v2  ;;  %v753_v30 = vsel %vm507_vm0, %v744_v4, 0  ;;  %v4838_v33 = vld [vmem:[%s5655_s3 + $0x1] ss:$0 sm:$0xff]  ;;  %v4892_v62 = vld [vmem:[%s5655_s3] ss:$0 sm:$0xff]  ;;  %2710 = vst.msk [vmem:[#allocation2 + $0x90] sm:$0xff] %vm1258_vm3, %v4477_v31 }
  0x96   : > { %3991 = vmatprep.subr.msk.bf16.mxu0 %vm507_vm0, %v3391_v3  ;;  %3990 = vmatprep.subr.msk.bf16.mxu1 %vm507_vm0, %v744_v4  ;;  %2711 = vst.msk [vmem:[#allocation2 + $0x98] sm:$0xff] %vm1258_vm3, %v4477_v31  ;;  %s4480_s20 = smov 32   ;;  %s4481_s29 = smov 64  }
  0x97   : > { %s3452_s15 = sld [smem:[#allocation10 + $0x1]]  ;;  %s3372_s11 = sshll.u32 %s4729_s8, 5 }
  0x98   : > { %s415_s14 = scalar_lea.vmem [#allocation11], %s3372_s11  ;;  %s3227_s28 = scalar_lea.sflag [#allocation5], %s4729_s8 }
  0x99   : > { %s3240_s18 = sshll.u32 %s415_s14, 4  ;;  %s5603_s18 = int_to_ptr.vmem [resolvable:$true] %s3240_s18 }
 0x113   : > { %v434_v5 = vpop.trf.xlu0 }
 0x117   : > { %v435_v6 = vpop.trf.xlu0 }
 0x118   : > { %v4767_v7 = vpack.c.bf16 %v435_v6, %v434_v5 }
 0x11a   : > { %3584 = vmatprep.mubr.msk.bf16.mxu0 %vm482_vm1, %v4767_v7 }
 0x11b   : > { %v436_v8 = vpop.trf.xlu0 }
 0x11f   : > { %v437_v9 = vpop.trf.xlu0 }
 0x120   : > { %v4771_v10 = vpack.c.bf16 %v437_v9, %v436_v8 }
 0x122   : > { %3585 = vmatmul.mubr.msk.bf16.vlgmr.msra.gmra.mrb[0].mxu0 %vm482_vm1, %v4771_v10 }
 0x123   : > { %v438_v12 = vpop.trf.xlu0  ;;  %3619 = vmatpush3.bf16.msra.mxu0 %v1079_v11 }
 0x124   : > { %3668 = vmatprep.subr.bf16.mxu0 %v4477_v31 }
 0x127   : > { %v439_v13 = vpop.trf.xlu0 }
 0x128   : > { %v4776_v14 = vpack.c.bf16 %v439_v13, %v438_v12 }
 0x12a   : > { %3588 = vmatprep.mubr.msk.bf16.mxu0 %vm482_vm1, %v4776_v14 }
 0x12b   : > { %v440_v15 = vpop.trf.xlu0 }
 0x12f   : > { %v441_v16 = vpop.trf.xlu0 }
 0x130   : > { %v4780_v17 = vpack.c.bf16 %v441_v16, %v440_v15 }
 0x132   : > { %3589 = vmatmul.mubr.msk.bf16.gmra.mrb[4].mxu0 %vm482_vm1, %v4780_v17 }
 0x133   : > { %v442_v18 = vpop.trf.xlu0 }
 0x137   : > { %v443_v19 = vpop.trf.xlu0 }
 0x138   : > { %v4784_v20 = vpack.c.bf16 %v443_v19, %v442_v18 }
 0x13a   : > { %3592 = vmatprep.mubr.msk.bf16.mxu0 %vm482_vm1, %v4784_v20 }
 0x13b   : > { %v444_v21 = vpop.trf.xlu0 }
 0x13f   : > { %v445_v22 = vpop.trf.xlu0 }
 0x140   : > { %v4788_v23 = vpack.c.bf16 %v445_v22, %v444_v21 }
 0x142   : > { %3593 = vmatmul.mubr.msk.bf16.gmra.mrb[8].mxu0 %vm482_vm1, %v4788_v23 }
 0x143   : > { %3620 = vmatprep.mubr.msk.bf16.mxu0 %vm482_vm1, %v4767_v7  ;;  %v446_v24 = vpop.trf.xlu0 }
 0x147   : > { %v447_v25 = vpop.trf.xlu0 }
 0x148   : > { %v4794_v26 = vpack.c.bf16 %v447_v25, %v446_v24 }
 0x14a   : > { %3621 = vmatmul.mubr.msk.bf16.vlgmr.msra.gmra.mrb[12].mxu0 %vm482_vm1, %v4771_v10  ;;  %3596 = vmatprep.mubr.msk.bf16.mxu1 %vm482_vm1, %v4794_v26 }
 0x14b   : > { %3624 = vmatprep.mubr.msk.bf16.mxu0 %vm482_vm1, %v4776_v14  ;;  %v448_v27 = vpop.trf.xlu0 }
 0x14f   : > { %v449_v28 = vpop.trf.xlu0 }
 0x150   : > { %v4802_v29 = vpack.c.bf16 %v449_v28, %v448_v27 }
 0x152   : > { %3597 = vmatmul.mubr.msk.bf16.vlgmr.msra.gmra.mrb[0].mxu1 %vm482_vm1, %v4802_v29  ;;  %3625 = vmatmul.mubr.msk.bf16.gmra.mrb[16].mxu0 %vm482_vm1, %v4780_v17 }
 0x153   : > { %3602 = vmatprep.mubr.msk.bf16.mxu1 %vm482_vm1, %v4767_v7  ;;  %3628 = vmatprep.mubr.msk.bf16.mxu0 %vm482_vm1, %v4784_v20 }
 0x154   : > { %3601 = vmatpush3.bf16.msra.mxu1 %v753_v30 }
 0x155   : > { %3636 = vmatprep.subr.bf16.mxu1 %v4477_v31 }
 0x15a   : > { %3603 = vmatmul.mubr.msk.bf16.vlgmr.msra.gmra.mrb[4].mxu1 %vm482_vm1, %v4771_v10  ;;  %3629 = vmatmul.mubr.msk.bf16.gmra.mrb[20].mxu0 %vm482_vm1, %v4788_v23 }
 0x15b   : > { %3606 = vmatprep.mubr.msk.bf16.mxu1 %vm482_vm1, %v4776_v14  ;;  %3632 = vmatprep.mubr.msk.bf16.mxu0 %vm482_vm1, %v4794_v26 }
 0x162   : > { %3607 = vmatmul.mubr.msk.bf16.gmra.mrb[8].mxu1 %vm482_vm1, %v4780_v17  ;;  %3633 = vmatmul.mubr.msk.bf16.gmra.mrb[24].mxu0 %vm482_vm1, %v4802_v29 }
 0x163   : > { %3610 = vmatprep.mubr.msk.bf16.mxu1 %vm482_vm1, %v4784_v20  ;;  %3672 = vmatprep.mubr.msk.bf16.mxu0 %vm4478_vm2, %v4477_v31 }
 0x16a   : > { %3611 = vmatmul.mubr.msk.bf16.gmra.mrb[12].mxu1 %vm482_vm1, %v4788_v23 }
 0x16b   : > { %3614 = vmatprep.mubr.msk.bf16.mxu1 %vm482_vm1, %v4794_v26 }
 0x172   : > { %3615 = vmatmul.mubr.msk.bf16.gmra.mrb[16].mxu1 %vm482_vm1, %v4802_v29 }
 0x173   : > { %3640 = vmatprep.mubr.msk.bf16.mxu1 %vm4478_vm2, %v4477_v31 }
 0x21d   : > { %v3622_v32 = vpop.f32.mrb[12].mxu0 }
 0x21e   : > { %v1115_v34 = vpop.f32.mrb[13].mxu0  ;;  %v4841_v36 = vadd.f32 %v3622_v32, %v4838_v33 }
 0x21f   : > { %v3623_v35 = vpop.f32.mrb[14].mxu0  ;;  %v4847_v39 = vadd.f32 %v4838_v33, %v1115_v34 }
 0x220   : > { %v4844_v37 = vadd.f32 %v3623_v35, %v4838_v33  ;;  %v1118_v38 = vpop.f32.mrb[15].mxu0 }
 0x221   : > { %v4850_v40 = vadd.f32 %v4838_v33, %v1118_v38 }
 0x222   : > { %v4101_v41 = vpack.i.bf16 %v4844_v37, %v4841_v36 }
 0x223   : > { %v4096_v43 = vpack.i.bf16 %v4850_v40, %v4847_v39  ;;  %v1242_v44 = vpack.c.bf16 %v4850_v40, %v4847_v39  ;;  %v466_v39 = vld [vmem:[%s4739_s24 + $0x40] sm:$0xff]  ;;  %v467_v40 = vld [vmem:[%s4739_s24 + $0x48] sm:$0xff] }
 0x225   : > { %v3626_v45 = vpop.f32.mrb[16].mxu0  ;;  %3637 = vmatpush3.bf16.msra.mxu1 %v1242_v44  ;;  %v4860_v46 = vpop.f32.mrb[0].mxu1 }
 0x226   : > { %v1131_v47 = vpop.f32.mrb[17].mxu0  ;;  %v4862_v48 = vpop.f32.mrb[1].mxu1  ;;  %3638 = vmatprep.subr.bf16.mxu1 %v4477_v31  ;;  %v4868_v51 = vadd.f32 %v3626_v45, %v4838_v33 }
 0x227   : > { %v3627_v49 = vpop.f32.mrb[18].mxu0  ;;  %v4865_v50 = vpop.f32.mrb[2].mxu1  ;;  %v4876_v55 = vadd.f32 %v4838_v33, %v1131_v47 }
 0x228   : > { %v4871_v52 = vadd.f32 %v3627_v49, %v4838_v33  ;;  %v1134_v53 = vpop.f32.mrb[19].mxu0  ;;  %v4873_v54 = vpop.f32.mrb[3].mxu1 }
 0x229   : > { %v4879_v56 = vadd.f32 %v4838_v33, %v1134_v53 }
 0x22a   : > { %v4111_v57 = vpack.i.bf16 %v4871_v52, %v4868_v51 }
 0x22b   : > { %v4106_v59 = vpack.i.bf16 %v4879_v56, %v4876_v55 }
 0x22d   : > { %v3604_v61 = vpop.f32.mrb[4].mxu1  ;;  %v3630_v63 = vpop.f32.mrb[20].mxu0 }
 0x22e   : > { %v789_v0 = vpop.f32.mrb[5].mxu1  ;;  %v1147_v1 = vpop.f32.mrb[21].mxu0  ;;  %v4907_v4 = vadd.f32 %v3604_v61, %v4892_v62  ;;  %v4910_v5 = vadd.f32 %v3630_v63, %v4838_v33 }
 0x22f   : > { %v3605_v2 = vpop.f32.mrb[6].mxu1  ;;  %v3631_v3 = vpop.f32.mrb[22].mxu0  ;;  %v4919_v12 = vadd.f32 %v4892_v62, %v789_v0  ;;  %v1148_v13 = vadd.f32 %v4838_v33, %v1147_v1 }
 0x230   : > { %v4913_v6 = vadd.f32 %v3605_v2, %v4892_v62  ;;  %v4916_v8 = vadd.f32 %v3631_v3, %v4838_v33  ;;  %v792_v9 = vpop.f32.mrb[7].mxu1  ;;  %v1150_v11 = vpop.f32.mrb[23].mxu0 }
 0x231   : > { %v4923_v15 = vadd.f32 %v4892_v62, %v792_v9  ;;  %v1151_v16 = vadd.f32 %v4838_v33, %v1150_v11 }
 0x232   : > { %v4131_v18 = vpack.i.bf16 %v4913_v6, %v4907_v4  ;;  %v4116_v21 = vpack.i.bf16 %v4916_v8, %v4910_v5 }
 0x233   : > { %v4126_v24 = vpack.i.bf16 %v4923_v15, %v4919_v12  ;;  %v4076_v27 = vpack.i.bf16 %v1151_v16, %v1148_v13  ;;  %v1250_v28 = vpack.c.bf16 %v1151_v16, %v1148_v13 }
 0x235   : > { %4077 = vrot.lane.b32.xlu0 %v4076_v27, %s4479_s25  ;;  %v3608_v30 = vpop.f32.mrb[8].mxu1  ;;  %v3634_v32 = vpop.f32.mrb[24].mxu0  ;;  %3669 = vmatpush3.bf16.msra.mxu0 %v1250_v28 }
 0x236   : > { %v4940_v34 = vadd.f32 %v3634_v32, %v4838_v33  ;;  %v805_v35 = vpop.f32.mrb[9].mxu1  ;;  %v1163_v38 = vpop.f32.mrb[25].mxu0  ;;  %3670 = vmatprep.subr.bf16.mxu0 %v4477_v31  ;;  %v4944_v47 = vadd.f32 %v3608_v30, %v4892_v62 }
 0x237   : > { %v3609_v44 = vpop.f32.mrb[10].mxu1  ;;  %v3635_v45 = vpop.f32.mrb[26].mxu0  ;;  %v4953_v0 = vadd.f32 %v4892_v62, %v805_v35  ;;  %v4956_v1 = vadd.f32 %v4838_v33, %v1163_v38 }
 0x238   : > { %v4947_v49 = vadd.f32 %v3609_v44, %v4892_v62  ;;  %v4950_v53 = vadd.f32 %v3635_v45, %v4838_v33  ;;  %v808_v61 = vpop.f32.mrb[11].mxu1  ;;  %v1166_v63 = vpop.f32.mrb[27].mxu0 }
 0x239   : > { %v4959_v2 = vadd.f32 %v4892_v62, %v808_v61  ;;  %v4962_v3 = vadd.f32 %v4838_v33, %v1166_v63 }
 0x23a   : > { %v4141_v9 = vpack.i.bf16 %v4947_v49, %v4944_v47  ;;  %v4121_v13 = vpack.i.bf16 %v4950_v53, %v4940_v34 }
 0x23b   : > { %v4136_v27 = vpack.i.bf16 %v4959_v2, %v4953_v0  ;;  %v4081_v30 = vpack.i.bf16 %v4962_v3, %v4956_v1 }
 0x23d   : > { %4082 = vrot.lane.b32.xlu1 %v4081_v30, %s4479_s25  ;;  %v3612_v32 = vpop.f32.mrb[12].mxu1 }
 0x23e   : > { %v821_v35 = vpop.f32.mrb[13].mxu1  ;;  %v4982_v44 = vadd.f32 %v3612_v32, %v4892_v62 }
 0x23f   : > { %v3613_v38 = vpop.f32.mrb[14].mxu1  ;;  %v4988_v63 = vadd.f32 %v4892_v62, %v821_v35 }
 0x240   : > { %v4985_v45 = vadd.f32 %v3613_v38, %v4892_v62  ;;  %v824_v61 = vpop.f32.mrb[15].mxu1 }
 0x241   : > { %v4991_v11 = vadd.f32 %v4892_v62, %v824_v61 }
 0x242   : > { %v4146_v28 = vpack.i.bf16 %v4985_v45, %v4982_v44 }
 0x243   : > { %v4086_v32 = vpack.i.bf16 %v4991_v11, %v4988_v63 }
 0x245   : > { %v3616_v19 = vpop.f32.mrb[16].mxu1  ;;  %4087 = vrot.lane.b32.xlu1 %v4086_v32, %s4479_s25 }
 0x246   : > { %v837_v35 = vpop.f32.mrb[17].mxu1  ;;  %v5003_v61 = vadd.f32 %v3616_v19, %v4892_v62 }
 0x247   : > { %v3617_v25 = vpop.f32.mrb[18].mxu1  ;;  %v5009_v30 = vadd.f32 %v4892_v62, %v837_v35 }
 0x248   : > { %v5006_v16 = vadd.f32 %v3617_v25, %v4892_v62  ;;  %v840_v22 = vpop.f32.mrb[19].mxu1 }
 0x249   : > { %v5012_v58 = vadd.f32 %v4892_v62, %v840_v22  ;;  %v470_v62 = vld [vmem:[%s4739_s24 + $0x60] sm:$0xff] }
 0x24a   : > { %v4151_v60 = vpack.i.bf16 %v5006_v16, %v5003_v61  ;;  %v944_v22 = vmax.f32 %v470_v62, 0.5 }
 0x24b   : > { %v4091_v19 = vpack.i.bf16 %v5012_v58, %v5009_v30 }
 0x24d   : > { %4092 = vrot.lane.b32.xlu1 %v4091_v19, %s4479_s25 }
 0x251   : > { %4097 = vrot.lane.b32.xlu1 %v4096_v43, %s4479_s25  ;;  %v941_v43 = vmax.f32 %v467_v40, 0.5 }
 0x255   : > { %4102 = vrot.lane.b32.xlu1 %v4101_v41, %s4479_s25  ;;  %v940_v41 = vmax.f32 %v466_v39, 0.5 }
 0x259   : > { %4107 = vrot.lane.b32.xlu1 %v4106_v59, %s4479_s25  ;;  %v957_v59 = vmin.f32 %v941_v43, 1.0 }
 0x25b   : > { %vm973_vm5 = vcmp.eq.f32.partialorder %v957_v59, 0.5 }
 0x25d   : > { %4112 = vrot.lane.b32.xlu1 %v4111_v57, %s4479_s25  ;;  %v956_v57 = vmin.f32 %v940_v41, 1.0 }
 0x25f   : > { %vm972_vm4 = vcmp.eq.f32.partialorder %v956_v57, 0.5 }
 0x261   : > { %4117 = vrot.lane.b32.xlu1 %v4116_v21, %s4479_s25  ;;  %v471_v21 = vld [vmem:[%s4739_s24 + $0x68] sm:$0xff] }
 0x265   : > { %4122 = vrot.lane.b32.xlu1 %v4121_v13, %s4479_s25  ;;  %v989_v13 = vsel %vm973_vm5, 0.0, %v957_v59 }
 0x266   : > { %vm1005_vm7 = vcmp.eq.f32.partialorder %v989_v13, 1.0 }
 0x267   : > { %v1021_v19 = vsel %vm1005_vm7, 0.0, %v989_v13 }
 0x268   : > { %vm1037_vm11 = vcmp.gt.f32.partialorder %v1021_v19, 0.0 }
 0x269   : > { %4127 = vrot.lane.b32.xlu1 %v4126_v24, %s4479_s25  ;;  %v988_v24 = vsel %vm972_vm4, 0.0, %v956_v57 }
 0x26a   : > { %vm1004_vm6 = vcmp.eq.f32.partialorder %v988_v24, 1.0 }
 0x26b   : > { %v1020_v35 = vsel %vm1004_vm6, 0.0, %v988_v24  ;;  %v621_v24 = vmax.f32 %v471_v21, 0.0 }
 0x26c   : > { %vm1036_vm10 = vcmp.gt.f32.partialorder %v1020_v35, 0.0 }
 0x26d   : > { %4132 = vrot.lane.b32.xlu1 %v4131_v18, %s4479_s25  ;;  %v945_v18 = vmax.f32 %v471_v21, 0.5  ;;  %v1052_v59 = vsel %vm1036_vm10, 1.0, %v1020_v35 }
 0x271   : > { %4137 = vrot.lane.b32.xlu1 %v4136_v27, %s4479_s25  ;;  %v960_v27 = vmin.f32 %v944_v22, 1.0  ;;  %v1053_v22 = vsel %vm1037_vm11, 1.0, %v1021_v19  ;;  %v637_v19 = vmin.f32 %v621_v24, 0.5  ;;  %v5077_v24 = vld [vmem:[%s4739_s24 + $0x10] sm:$0xff] }
 0x272   : > { %v1064_v25 = vpack.c.bf16 %v1053_v22, %v1052_v59  ;;  %v5688_v59 = vpack.c.bf16 %v4962_v3, %v4956_v1  ;;  %v934_v3 = vmax.f32 %v5077_v24, 0.5 }
 0x273   : > { %vm976_vm8 = vcmp.eq.f32.partialorder %v960_v27, 0.5 }
 0x274   : > { %v992_v41 = vsel %vm976_vm8, 0.0, %v960_v27 }
 0x275   : > { %4142 = vrot.lane.b32.xlu1 %v4141_v9, %s4479_s25  ;;  %v961_v9 = vmin.f32 %v945_v18, 1.0  ;;  %vm1008_vm12 = vcmp.eq.f32.partialorder %v992_v41, 1.0  ;;  %v620_v18 = vmax.f32 %v470_v62, 0.0 }
 0x276   : > { %v1024_v13 = vsel %vm1008_vm12, 0.0, %v992_v41 }
 0x277   : > { %vm977_vm9 = vcmp.eq.f32.partialorder %v961_v9, 0.5  ;;  %vm1040_vm4 = vcmp.gt.f32.partialorder %v1024_v13, 0.0  ;;  %v636_v35 = vmin.f32 %v620_v18, 0.5 }
 0x278   : > { %v993_v43 = vsel %vm977_vm9, 0.0, %v961_v9  ;;  %vm653_vm9 = vcmp.eq.f32.partialorder %v637_v19, 0.0 }
 0x279   : > { %4147 = vrot.lane.b32.xlu1 %v4146_v28, %s4479_s25  ;;  %v616_v28 = vmax.f32 %v466_v39, 0.0  ;;  %vm1009_vm13 = vcmp.eq.f32.partialorder %v993_v43, 1.0  ;;  %vm652_vm8 = vcmp.eq.f32.partialorder %v636_v35, 0.0  ;;  %v669_v1 = vsel %vm653_vm9, 0.0, %v637_v19 }
 0x27a   : > { %v1025_v27 = vsel %vm1009_vm13, 0.0, %v993_v43 }
 0x27b   : > { %v632_v32 = vmin.f32 %v616_v28, 0.5  ;;  %v5061_v28 = vld [vmem:[%s4739_s24] sm:$0xff]  ;;  %vm1041_vm5 = vcmp.gt.f32.partialorder %v1025_v27, 0.0 }
 0x27c   : > { %v932_v62 = vmax.f32 %v5061_v28, 0.5 }
 0x27d   : > { %4152 = vrot.lane.b32.xlu1 %v4151_v60, %s4479_s25  ;;  %v617_v60 = vmax.f32 %v467_v40, 0.0  ;;  %vm648_vm14 = vcmp.eq.f32.partialorder %v632_v32, 0.0 }
 0x27e   : > { %v664_v38 = vsel %vm648_vm14, 0.0, %v632_v32  ;;  %v1056_v32 = vsel %vm1040_vm4, 1.0, %v1024_v13  ;;  %v5080_v13 = vld [vmem:[%s4739_s24 + $0x18] sm:$0xff] }
 0x27f   : > { %v633_v42 = vmin.f32 %v617_v60, 0.5  ;;  %v5064_v60 = vld [vmem:[%s4739_s24 + $0x8] sm:$0xff]  ;;  %vm680_vm6 = vcmp.eq.f32.partialorder %v664_v38, 0.5 }
 0x280   : > { %v933_v21 = vmax.f32 %v5064_v60, 0.5  ;;  %v696_v22 = vsel %vm680_vm6, 0.0, %v664_v38 }
 0x281   : > { %vm649_vm15 = vcmp.eq.f32.partialorder %v633_v42, 0.0  ;;  %vm712_vm10 = vcmp.gt.f32.partialorder %v696_v22, 0.0 }
 0x282   : > { %v665_v33 = vsel %vm649_vm15, 0.0, %v633_v42  ;;  %v1057_v42 = vsel %vm1041_vm5, 1.0, %v1025_v27  ;;  %vm685_vm15 = vcmp.eq.f32.partialorder %v669_v1, 0.5 }
 0x283   : > { %vm681_vm7 = vcmp.eq.f32.partialorder %v665_v33, 0.5  ;;  %v1066_v27 = vpack.c.bf16 %v1057_v42, %v1056_v32 }
 0x2a7   : > { %v4078_v57 = vpop.permute.xlu0 %4077 }
 0x2a8   : > { %v4080_v39 = vunpack.i.h.bf16 %v4078_v57  ;;  %v4079_v40 = vunpack.i.l.bf16 %v4078_v57 }
 0x2aa   : > { %v1251_v9 = vpack.c.bf16 %v4080_v39, %v4079_v40  ;;  %v697_v39 = vsel %vm681_vm7, 0.0, %v665_v33  ;;  %v948_v40 = vmin.f32 %v932_v62, 1.0  ;;  %v935_v33 = vmax.f32 %v5080_v13, 0.5 }
 0x2ab   : > { %vm713_vm11 = vcmp.gt.f32.partialorder %v697_v39, 0.0 }
 0x2ac   : > { %3671 = vmatpush3.bf16.msra.mxu0 %v1251_v9  ;;  %v668_v9 = vsel %vm652_vm8, 0.0, %v636_v35  ;;  %vm964_vm12 = vcmp.eq.f32.partialorder %v948_v40, 0.5  ;;  %v728_v35 = vsel %vm712_vm10, 1.0, %v696_v22  ;;  %v729_v19 = vsel %vm713_vm11, 1.0, %v697_v39  ;;  %v5093_v22 = vld [vmem:[%s4739_s24 + $0x20] sm:$0xff]  ;;  %v5096_v39 = vld [vmem:[%s4739_s24 + $0x28] sm:$0xff] }
 0x2ad   : > { %3684 = vmatprep.subr.bf16.mxu0 %v4477_v31  ;;  %vm684_vm14 = vcmp.eq.f32.partialorder %v668_v9, 0.5  ;;  %v980_v32 = vsel %vm964_vm12, 0.0, %v948_v40 }
 0x2ae   : > { %vm996_vm4 = vcmp.eq.f32.partialorder %v980_v32, 1.0 }
 0x2af   : > { %v4083_v41 = vpop.permute.xlu1 %4082  ;;  %3673 = vmatmul.mubr.msk.bf16.vlgmr.msra.gmra.mrb[28].mxu0 %vm1258_vm3, %v1064_v25  ;;  %v949_v25 = vmin.f32 %v933_v21, 1.0  ;;  %v1012_v40 = vsel %vm996_vm4, 0.0, %v980_v32 }
 0x2b0   : > { %v4085_v43 = vunpack.i.h.bf16 %v4083_v41  ;;  %v4084_v57 = vunpack.i.l.bf16 %v4083_v41  ;;  %3685 = vmatpush3.bf16.msra.mxu0 %v5688_v59  ;;  %3688 = vmatprep.mubr.msk.bf16.mxu0 %vm4478_vm2, %v4477_v31  ;;  %v5689_v41 = vpack.c.bf16 %v4991_v11, %v4988_v63  ;;  %v950_v59 = vmin.f32 %v934_v3, 1.0 }
 0x2b1   : > { %3686 = vmatprep.subr.bf16.mxu0 %v4477_v31  ;;  %vm965_vm13 = vcmp.eq.f32.partialorder %v949_v25, 0.5  ;;  %v936_v11 = vmax.f32 %v5093_v22, 0.5  ;;  %v937_v63 = vmax.f32 %v5096_v39, 0.5  ;;  %vm1028_vm10 = vcmp.gt.f32.partialorder %v1012_v40, 0.0 }
 0x2b2   : > { %v1255_v18 = vpack.c.bf16 %v4085_v43, %v4084_v57  ;;  %v981_v42 = vsel %vm965_vm13, 0.0, %v949_v25  ;;  %v700_v43 = vsel %vm684_vm14, 0.0, %v668_v9  ;;  %v701_v57 = vsel %vm685_vm15, 0.0, %v669_v1 }
 0x2b3   : > { %vm997_vm5 = vcmp.eq.f32.partialorder %v981_v42, 1.0  ;;  %vm716_vm6 = vcmp.gt.f32.partialorder %v700_v43, 0.0  ;;  %vm717_vm7 = vcmp.gt.f32.partialorder %v701_v57, 0.0  ;;  %vm966_vm8 = vcmp.eq.f32.partialorder %v950_v59, 0.5 }
 0x2b4   : > { %3687 = vmatpush3.bf16.msra.mxu0 %v1255_v18  ;;  %v951_v18 = vmin.f32 %v935_v33, 1.0  ;;  %v1013_v25 = vsel %vm997_vm5, 0.0, %v981_v42  ;;  %v732_v1 = vsel %vm716_vm6, 1.0, %v700_v43  ;;  %v733_v3 = vsel %vm717_vm7, 1.0, %v701_v57  ;;  %v3418_v43 = vld [vmem:[%s5654_s2 + $0x4] sm:$0x3] }
 0x2b5   : > { %3732 = vmatprep.subr.bf16.mxu0 %v4477_v31  ;;  %vm1029_vm11 = vcmp.gt.f32.partialorder %v1013_v25, 0.0  ;;  %v953_v32 = vmin.f32 %v937_v63, 1.0  ;;  %v5112_v57 = vld [vmem:[%s4739_s24 + $0x30] sm:$0xff] }
 0x2b6   : > { %vm967_vm9 = vcmp.eq.f32.partialorder %v951_v18, 0.5 }
 0x2b7   : > { %v4088_v38 = vpop.permute.xlu1 %4087  ;;  %3689 = vmatmul.mubr.msk.bf16.vlgmr.msra.gmra.mrb[32].mxu0 %vm1258_vm3, %v1066_v27  ;;  %vm969_vm15 = vcmp.eq.f32.partialorder %v953_v32, 0.5 }
 0x2b8   : > { %v4090_v62 = vunpack.i.h.bf16 %v4088_v38  ;;  %v4089_v21 = vunpack.i.l.bf16 %v4088_v38  ;;  %3733 = vmatpush3.bf16.msra.mxu0 %v5689_v41  ;;  %3736 = vmatprep.mubr.msk.bf16.mxu0 %vm4478_vm2, %v4477_v31  ;;  %v740_v38 = vpack.c.bf16 %v729_v19, %v728_v35  ;;  %v5690_v19 = vpack.c.bf16 %v5012_v58, %v5009_v30  ;;  %v5115_v58 = vld [vmem:[%s4739_s24 + $0x38] sm:$0xff] }
 0x2b9   : > { %3734 = vmatprep.subr.bf16.mxu0 %v4477_v31  ;;  %v952_v41 = vmin.f32 %v936_v11, 1.0  ;;  %v938_v11 = vmax.f32 %v5112_v57, 0.5  ;;  %v939_v63 = vmax.f32 %v5115_v58, 0.5 }
 0x2ba   : > { %v925_v27 = vpack.c.bf16 %v4090_v62, %v4089_v21  ;;  %v982_v62 = vsel %vm966_vm8, 0.0, %v950_v59  ;;  %v983_v21 = vsel %vm967_vm9, 0.0, %v951_v18 }
 0x2bb   : > { %vm998_vm12 = vcmp.eq.f32.partialorder %v982_v62, 1.0  ;;  %vm999_vm13 = vcmp.eq.f32.partialorder %v983_v21, 1.0  ;;  %vm968_vm14 = vcmp.eq.f32.partialorder %v952_v41, 0.5 }
 0x2bc   : > { %3735 = vmatpush3.bf16.msra.mxu0 %v925_v27  ;;  %v742_v27 = vpack.c.bf16 %v733_v3, %v732_v1  ;;  %v1015_v1 = vsel %vm999_vm13, 0.0, %v983_v21 }
 0x2bd   : > { %3748 = vmatprep.subr.bf16.mxu0 %v4477_v31  ;;  %vm1031_vm5 = vcmp.gt.f32.partialorder %v1015_v1, 0.0 }
 0x2bf   : > { %v4093_v9 = vpop.permute.xlu1 %4092  ;;  %3737 = vmatmul.mubr.msk.bf16.vlgmr.msra.gmra.mrb[28].mxu0 %vm1258_vm3, %v740_v38  ;;  %v1044_v38 = vsel %vm1028_vm10, 1.0, %v1012_v40 }
 0x2c0   : > { %v4095_v33 = vunpack.i.h.bf16 %v4093_v9  ;;  %v4094_v35 = vunpack.i.l.bf16 %v4093_v9  ;;  %3749 = vmatpush3.bf16.msra.mxu0 %v5690_v19  ;;  %3752 = vmatprep.mubr.msk.bf16.mxu0 %vm4478_vm2, %v4477_v31  ;;  %v1045_v9 = vsel %vm1029_vm11, 1.0, %v1013_v25  ;;  %v1014_v19 = vsel %vm998_vm12, 0.0, %v982_v62 }
 0x2c1   : > { %3750 = vmatprep.subr.bf16.mxu0 %v4477_v31  ;;  %v1060_v40 = vpack.c.bf16 %v1045_v9, %v1044_v38  ;;  %v984_v25 = vsel %vm968_vm14, 0.0, %v952_v41  ;;  %vm1030_vm4 = vcmp.gt.f32.partialorder %v1014_v19, 0.0  ;;  %v955_v62 = vmin.f32 %v939_v63, 1.0 }
 0x2c2   : > { %v929_v42 = vpack.c.bf16 %v4095_v33, %v4094_v35  ;;  %v2110_v35 = vsel %vm507_vm0, %v3418_v43, 0  ;;  %v1046_v41 = vsel %vm1030_vm4, 1.0, %v1014_v19 }
 0x2c3   : > { %v4098_v30 = vpop.permute.xlu1 %4097  ;;  %vm971_vm8 = vcmp.eq.f32.partialorder %v955_v62, 0.5 }
 0x2c4   : > { %v4100_v59 = vunpack.i.h.bf16 %v4098_v30  ;;  %v4099_v18 = vunpack.i.l.bf16 %v4098_v30  ;;  %3751 = vmatpush3.bf16.msra.mxu0 %v929_v42  ;;  %v985_v42 = vsel %vm969_vm15, 0.0, %v953_v32  ;;  %v1047_v32 = vsel %vm1031_vm5, 1.0, %v1015_v1 }
 0x2c5   : > { %3992 = vmatprep.subr.msk.bf16.mxu0 %vm507_vm0, %v3418_v43  ;;  %v954_v43 = vmin.f32 %v938_v11, 1.0  ;;  %vm1000_vm0 = vcmp.eq.f32.partialorder %v984_v25, 1.0  ;;  %vm1001_vm6 = vcmp.eq.f32.partialorder %v985_v42, 1.0 }
 0x2c6   : > { %v1243_v33 = vpack.c.bf16 %v4100_v59, %v4099_v18  ;;  %v5126_v59 = vld [vmem:[%s4739_s24 + $0x50] sm:$0xff]  ;;  %v5129_v18 = vld [vmem:[%s4739_s24 + $0x58] sm:$0xff]  ;;  %v1016_v11 = vsel %vm1000_vm0, 0.0, %v984_v25  ;;  %v1017_v63 = vsel %vm1001_vm6, 0.0, %v985_v42 }
 0x2c7   : > { %v4103_v3 = vpop.permute.xlu1 %4102  ;;  %3753 = vmatmul.mubr.msk.bf16.vlgmr.msra.gmra.mrb[32].mxu0 %vm1258_vm3, %v742_v27  ;;  %vm970_vm7 = vcmp.eq.f32.partialorder %v954_v43, 0.5  ;;  %v942_v27 = vmax.f32 %v5126_v59, 0.5  ;;  %v943_v38 = vmax.f32 %v5129_v18, 0.5  ;;  %vm1032_vm9 = vcmp.gt.f32.partialorder %v1016_v11, 0.0  ;;  %v5147_v25 = vld [vmem:[%s4739_s24 + $0x70] sm:$0xff]  ;;  %v5150_v42 = vld [vmem:[%s4739_s24 + $0x78] sm:$0xff] }
 0x2c8   : > { %3639 = vmatpush3.bf16.msra.mxu1 %v1243_v33  ;;  %3766 = vmatprep.mubr.msk.bf16.mxu0 %vm482_vm1, %v4767_v7  ;;  %v4105_v21 = vunpack.i.h.bf16 %v4103_v3  ;;  %v4104_v30 = vunpack.i.l.bf16 %v4103_v3  ;;  %v5691_v7 = vpack.c.bf16 %v4844_v37, %v4841_v36  ;;  %v1061_v37 = vpack.c.bf16 %v1047_v32, %v1046_v41 }
 0x2c9   : > { %3644 = vmatprep.subr.bf16.mxu1 %v4477_v31  ;;  %3765 = vmatpush3.bf16.msra.mxu0 %v2110_v35  ;;  %v986_v33 = vsel %vm970_vm7, 0.0, %v954_v43  ;;  %v987_v35 = vsel %vm971_vm8, 0.0, %v955_v62  ;;  %vm1033_vm10 = vcmp.gt.f32.partialorder %v1017_v63, 0.0  ;;  %v958_v19 = vmin.f32 %v942_v27, 1.0 }
 0x2ca   : > { %3814 = vmatprep.subr.bf16.mxu0 %v4477_v31  ;;  %v1245_v9 = vpack.c.bf16 %v4105_v21, %v4104_v30  ;;  %v959_v1 = vmin.f32 %v943_v38, 1.0  ;;  %vm1002_vm11 = vcmp.eq.f32.partialorder %v986_v33, 1.0  ;;  %vm1003_vm12 = vcmp.eq.f32.partialorder %v987_v35, 1.0 }
 0x2cb   : > { %3641 = vmatmul.mubr.msk.bf16.vlgmr.msra.gmra.mrb[20].mxu1 %vm1258_vm3, %v1060_v40  ;;  %v4108_v36 = vpop.permute.xlu1 %4107  ;;  %v1049_v43 = vsel %vm1033_vm10, 1.0, %v1017_v63  ;;  %vm974_vm13 = vcmp.eq.f32.partialorder %v958_v19, 0.5  ;;  %v946_v62 = vmax.f32 %v5147_v25, 0.5  ;;  %v947_v21 = vmax.f32 %v5150_v42, 0.5 }
 0x2cc   : > { %3645 = vmatpush3.bf16.msra.mxu1 %v5691_v7  ;;  %3648 = vmatprep.mubr.msk.bf16.mxu1 %vm4478_vm2, %v4477_v31  ;;  %v4110_v3 = vunpack.i.h.bf16 %v4108_v36  ;;  %v4109_v40 = vunpack.i.l.bf16 %v4108_v36  ;;  %vm975_vm14 = vcmp.eq.f32.partialorder %v959_v1, 0.5  ;;  %v1018_v7 = vsel %vm1002_vm11, 0.0, %v986_v33 }
 0x2cd   : > { %3646 = vmatprep.subr.bf16.mxu1 %v4477_v31  ;;  %v1019_v41 = vsel %vm1003_vm12, 0.0, %v987_v35  ;;  %v991_v27 = vsel %vm975_vm14, 0.0, %v959_v1  ;;  %vm1034_vm15 = vcmp.gt.f32.partialorder %v1018_v7, 0.0  ;;  %v962_v38 = vmin.f32 %v946_v62, 1.0 }
 0x2ce   : > { %v1247_v30 = vpack.c.bf16 %v4110_v3, %v4109_v40  ;;  %vm1035_vm4 = vcmp.gt.f32.partialorder %v1019_v41, 0.0  ;;  %vm1007_vm0 = vcmp.eq.f32.partialorder %v991_v27, 1.0  ;;  %v609_v33 = vmax.f32 %v5064_v60, 0.0 }
 0x2cf   : > { %3767 = vmatmul.mubr.msk.bf16.vlgmr.msra.gmra.mrb[36].mxu0 %vm482_vm1, %v4771_v10  ;;  %v5692_v10 = vpack.c.bf16 %v4879_v56, %v4876_v55  ;;  %v4113_v32 = vpop.permute.xlu1 %4112  ;;  %v990_v56 = vsel %vm974_vm13, 0.0, %v958_v19  ;;  %v1051_v36 = vsel %vm1035_vm4, 1.0, %v1019_v41  ;;  %vm978_vm6 = vcmp.eq.f32.partialorder %v962_v38, 0.5 }
 0x2d0   : > { %3647 = vmatpush3.bf16.msra.mxu1 %v1245_v9  ;;  %3770 = vmatprep.mubr.msk.bf16.mxu0 %vm482_vm1, %v4776_v14  ;;  %v1048_v14 = vsel %vm1032_vm9, 1.0, %v1016_v11  ;;  %v963_v9 = vmin.f32 %v947_v21, 1.0  ;;  %v4115_v11 = vunpack.i.h.bf16 %v4113_v32  ;;  %v4114_v63 = vunpack.i.l.bf16 %v4113_v32 }
 0x2d1   : > { %3652 = vmatprep.subr.bf16.mxu1 %v4477_v31  ;;  %v1062_v55 = vpack.c.bf16 %v1049_v43, %v1048_v14  ;;  %vm1006_vm5 = vcmp.eq.f32.partialorder %v990_v56, 1.0  ;;  %v1023_v1 = vsel %vm1007_vm0, 0.0, %v991_v27  ;;  %v625_v14 = vmin.f32 %v609_v33, 0.5 }
 0x2d2   : > { %vm979_vm7 = vcmp.eq.f32.partialorder %v963_v9, 0.5  ;;  %v1249_v35 = vpack.c.bf16 %v4115_v11, %v4114_v63  ;;  %v1022_v19 = vsel %vm1006_vm5, 0.0, %v990_v56  ;;  %vm1039_vm9 = vcmp.gt.f32.partialorder %v1023_v1, 0.0 }
 0x2d3   : > { %3649 = vmatmul.mubr.msk.bf16.vlgmr.msra.gmra.mrb[24].mxu1 %vm1258_vm3, %v1061_v37  ;;  %v608_v37 = vmax.f32 %v5061_v28, 0.0  ;;  %v4118_v3 = vpop.permute.xlu1 %4117  ;;  %v995_v40 = vsel %vm979_vm7, 0.0, %v963_v9  ;;  %vm1038_vm8 = vcmp.gt.f32.partialorder %v1022_v19, 0.0  ;;  %v1055_v21 = vsel %vm1039_vm9, 1.0, %v1023_v1 }
 0x2d4   : > { %3653 = vmatpush3.bf16.msra.mxu1 %v5692_v10  ;;  %3656 = vmatprep.mubr.msk.bf16.mxu1 %vm4478_vm2, %v4477_v31  ;;  %v4120_v43 = vunpack.i.h.bf16 %v4118_v3  ;;  %v4119_v62 = vunpack.i.l.bf16 %v4118_v3  ;;  %vm1011_vm11 = vcmp.eq.f32.partialorder %v995_v40, 1.0  ;;  %vm641_vm13 = vcmp.eq.f32.partialorder %v625_v14, 0.0 }
 0x2d5   : > { %3654 = vmatprep.subr.bf16.mxu1 %v4477_v31  ;;  %v624_v10 = vmin.f32 %v608_v37, 0.5  ;;  %v657_v27 = vsel %vm641_vm13, 0.0, %v625_v14  ;;  %v613_v37 = vmax.f32 %v5096_v39, 0.0  ;;  %v5696_v14 = vpack.c.bf16 %v4923_v15, %v4919_v12 }
 0x2d6   : > { %v1253_v41 = vpack.c.bf16 %v4120_v43, %v4119_v62  ;;  %vm673_vm5 = vcmp.eq.f32.partialorder %v657_v27, 0.5 }
 0x2d7   : > { %3771 = vmatmul.mubr.msk.bf16.gmra.mrb[40].mxu0 %vm482_vm1, %v4780_v17  ;;  %v5693_v17 = vpack.c.bf16 %v4871_v52, %v4868_v51  ;;  %v994_v52 = vsel %vm978_vm6, 0.0, %v962_v38  ;;  %vm640_vm12 = vcmp.eq.f32.partialorder %v624_v10, 0.0  ;;  %v4123_v56 = vpop.permute.xlu1 %4122 }
 0x2d8   : > { %3655 = vmatpush3.bf16.msra.mxu1 %v1247_v30  ;;  %3774 = vmatprep.mubr.msk.bf16.mxu0 %vm482_vm1, %v4784_v20  ;;  %v1050_v20 = vsel %vm1034_vm15, 1.0, %v1018_v7  ;;  %vm1010_vm10 = vcmp.eq.f32.partialorder %v994_v52, 1.0  ;;  %v610_v30 = vmax.f32 %v5077_v24, 0.0  ;;  %v611_v7 = vmax.f32 %v5080_v13, 0.0 }
 0x2d9   : > { %3660 = vmatprep.subr.bf16.mxu1 %v4477_v31  ;;  %v1063_v51 = vpack.c.bf16 %v1051_v36, %v1050_v20  ;;  %v1026_v32 = vsel %vm1010_vm10, 0.0, %v994_v52  ;;  %v4125_v11 = vunpack.i.h.bf16 %v4123_v56  ;;  %v4124_v63 = vunpack.i.l.bf16 %v4123_v56 }
 0x2da   : > { %vm1042_vm14 = vcmp.gt.f32.partialorder %v1026_v32, 0.0  ;;  %v626_v38 = vmin.f32 %v610_v30, 0.5  ;;  %v627_v9 = vmin.f32 %v611_v7, 0.5  ;;  %v612_v36 = vmax.f32 %v5093_v22, 0.0 }
 0x2db   : > { %3657 = vmatmul.mubr.msk.bf16.vlgmr.msra.gmra.mrb[28].mxu1 %vm1258_vm3, %v1062_v55  ;;  %v1027_v55 = vsel %vm1011_vm11, 0.0, %v995_v40  ;;  %v1257_v33 = vpack.c.bf16 %v4125_v11, %v4124_v63  ;;  %v4128_v1 = vpop.permute.xlu1 %4127  ;;  %v629_v52 = vmin.f32 %v613_v37, 0.5  ;;  %v618_v11 = vmax.f32 %v5126_v59, 0.0 }
 0x2dc   : > { %3661 = vmatpush3.bf16.msra.mxu1 %v5693_v17  ;;  %3664 = vmatprep.mubr.msk.bf16.mxu1 %vm4478_vm2, %v4477_v31  ;;  %vm1043_vm15 = vcmp.gt.f32.partialorder %v1027_v55, 0.0  ;;  %v1058_v17 = vsel %vm1042_vm14, 1.0, %v1026_v32  ;;  %vm643_vm0 = vcmp.eq.f32.partialorder %v627_v9, 0.0  ;;  %v4130_v40 = vunpack.i.h.bf16 %v4128_v1 }
 0x2dd   : > { %3662 = vmatprep.subr.bf16.mxu1 %v4477_v31  ;;  %v1059_v20 = vsel %vm1043_vm15, 1.0, %v1027_v55  ;;  %vm645_vm11 = vcmp.eq.f32.partialorder %v629_v52, 0.0  ;;  %v619_v63 = vmax.f32 %v5129_v18, 0.0 }
 0x2de   : > { %v1067_v3 = vpack.c.bf16 %v1059_v20, %v1058_v17  ;;  %v661_v15 = vsel %vm645_vm11, 0.0, %v629_v52 }
 0x2df   : > { %3775 = vmatmul.mubr.msk.bf16.gmra.mrb[44].mxu0 %vm482_vm1, %v4788_v23  ;;  %v5694_v23 = vpack.c.bf16 %v4916_v8, %v4910_v5  ;;  %v656_v8 = vsel %vm640_vm12, 0.0, %v624_v10  ;;  %v4129_v10 = vunpack.i.l.bf16 %v4128_v1  ;;  %vm677_vm15 = vcmp.eq.f32.partialorder %v661_v15, 0.5 }
 0x2e0   : > { %3663 = vmatpush3.bf16.msra.mxu1 %v1249_v35  ;;  %3778 = vmatprep.mubr.msk.bf16.mxu0 %vm482_vm1, %v4794_v26  ;;  %v1054_v26 = vsel %vm1038_vm8, 1.0, %v1022_v19  ;;  %vm672_vm4 = vcmp.eq.f32.partialorder %v656_v8, 0.5  ;;  %v689_v19 = vsel %vm673_vm5, 0.0, %v657_v27  ;;  %v5697_v27 = vpack.c.bf16 %v4913_v6, %v4907_v4 }
 0x2e1   : > { %3676 = vmatprep.subr.bf16.mxu1 %v4477_v31  ;;  %v1065_v5 = vpack.c.bf16 %v1055_v21, %v1054_v26  ;;  %v688_v35 = vsel %vm672_vm4, 0.0, %v656_v8  ;;  %vm705_vm7 = vcmp.gt.f32.partialorder %v689_v19, 0.0  ;;  %v615_v26 = vmax.f32 %v5115_v58, 0.0 }
 0x2e2   : > { %vm704_vm6 = vcmp.gt.f32.partialorder %v688_v35, 0.0  ;;  %v721_v62 = vsel %vm705_vm7, 1.0, %v689_v19  ;;  %v917_v21 = vpack.c.bf16 %v4130_v40, %v4129_v10  ;;  %v693_v20 = vsel %vm677_vm15, 0.0, %v661_v15 }
 0x2e3   : > { %3665 = vmatmul.mubr.msk.bf16.vlgmr.msra.gmra.mrb[32].mxu1 %vm1258_vm3, %v1063_v51  ;;  %v628_v51 = vmin.f32 %v612_v36, 0.5  ;;  %v720_v43 = vsel %vm704_vm6, 1.0, %v688_v35  ;;  %v631_v56 = vmin.f32 %v615_v26, 0.5  ;;  %v635_v35 = vmin.f32 %v619_v63, 0.5 }
 0x2e4   : > { %3677 = vmatpush3.bf16.msra.mxu1 %v5694_v23  ;;  %3680 = vmatprep.mubr.msk.bf16.mxu1 %vm4478_vm2, %v4477_v31  ;;  %v614_v23 = vmax.f32 %v5112_v57, 0.0  ;;  %v736_v32 = vpack.c.bf16 %v721_v62, %v720_v43  ;;  %v623_v63 = vmax.f32 %v5150_v42, 0.0 }
 0x2e5   : > { %3678 = vmatprep.subr.bf16.mxu1 %v4477_v31  ;;  %vm644_vm10 = vcmp.eq.f32.partialorder %v628_v51, 0.0  ;;  %vm647_vm5 = vcmp.eq.f32.partialorder %v631_v56, 0.0 }
 0x2e6   : > { %v660_v12 = vsel %vm644_vm10, 0.0, %v628_v51  ;;  %v630_v55 = vmin.f32 %v614_v23, 0.5  ;;  %v663_v6 = vsel %vm647_vm5, 0.0, %v631_v56  ;;  %v5699_v23 = vpack.c.bf16 %v4947_v49, %v4944_v47 }
 0x2e7   : > { %3779 = vmatmul.mubr.msk.bf16.gmra.mrb[48].mxu0 %vm482_vm1, %v4802_v29  ;;  %v5695_v29 = vpack.c.bf16 %v4950_v53, %v4940_v34  ;;  %vm642_vm1 = vcmp.eq.f32.partialorder %v626_v38, 0.0  ;;  %v659_v53 = vsel %vm643_vm0, 0.0, %v627_v9  ;;  %vm676_vm14 = vcmp.eq.f32.partialorder %v660_v12, 0.5 }
 0x2e8   : > { %3679 = vmatpush3.bf16.msra.mxu1 %v1253_v41  ;;  %3818 = vmatprep.mubr.msk.bf16.mxu0 %vm4478_vm2, %v4477_v31  ;;  %v658_v34 = vsel %vm642_vm1, 0.0, %v626_v38  ;;  %vm675_vm9 = vcmp.eq.f32.partialorder %v659_v53, 0.5  ;;  %v4133_v41 = vpop.permute.xlu1 %4132  ;;  %vm646_vm4 = vcmp.eq.f32.partialorder %v630_v55, 0.0  ;;  %v692_v17 = vsel %vm676_vm14, 0.0, %v660_v12 }
 0x2e9   : > { %3692 = vmatprep.subr.bf16.mxu1 %v4477_v31  ;;  %vm674_vm8 = vcmp.eq.f32.partialorder %v658_v34, 0.5  ;;  %v691_v7 = vsel %vm675_vm9, 0.0, %v659_v53  ;;  %v4134_v8 = vunpack.i.l.bf16 %v4133_v41  ;;  %v662_v4 = vsel %vm646_vm4, 0.0, %v630_v55 }
 0x2ea   : > { %v690_v30 = vsel %vm674_vm8, 0.0, %v658_v34  ;;  %vm707_vm13 = vcmp.gt.f32.partialorder %v691_v7, 0.0  ;;  %vm708_vm1 = vcmp.gt.f32.partialorder %v692_v17, 0.0  ;;  %vm709_vm0 = vcmp.gt.f32.partialorder %v693_v20, 0.0 }
 0x2eb   : > { %3681 = vmatmul.mubr.msk.bf16.vlgmr.msra.gmra.mrb[36].mxu1 %vm1258_vm3, %v1065_v5  ;;  %vm706_vm12 = vcmp.gt.f32.partialorder %v690_v30, 0.0  ;;  %v4135_v5 = vunpack.i.h.bf16 %v4133_v41  ;;  %v723_v9 = vsel %vm707_vm13, 1.0, %v691_v7  ;;  %vm678_vm6 = vcmp.eq.f32.partialorder %v662_v4, 0.5 }
 0x2ec   : > { %3693 = vmatpush3.bf16.msra.mxu1 %v5695_v29  ;;  %3696 = vmatprep.mubr.msk.bf16.mxu1 %vm4478_vm2, %v4477_v31  ;;  %v722_v38 = vsel %vm706_vm12, 1.0, %v690_v30  ;;  %v4138_v36 = vpop.permute.xlu1 %4137  ;;  %vm679_vm7 = vcmp.eq.f32.partialorder %v663_v6, 0.5  ;;  %v724_v34 = vsel %vm708_vm1, 1.0, %v692_v17  ;;  %v725_v53 = vsel %vm709_vm0, 1.0, %v693_v20 }
 0x2ed   : > { %3694 = vmatprep.subr.bf16.mxu1 %v4477_v31  ;;  %v919_v29 = vpack.c.bf16 %v4135_v5, %v4134_v8  ;;  %v737_v37 = vpack.c.bf16 %v723_v9, %v722_v38  ;;  %v4140_v19 = vunpack.i.h.bf16 %v4138_v36  ;;  %v4139_v1 = vunpack.i.l.bf16 %v4138_v36 }
 0x2ee   : > { %vm651_vm9 = vcmp.eq.f32.partialorder %v635_v35, 0.0  ;;  %v694_v52 = vsel %vm678_vm6, 0.0, %v662_v4  ;;  %v695_v40 = vsel %vm679_vm7, 0.0, %v663_v6  ;;  %v5700_v49 = vpack.c.bf16 %v4985_v45, %v4982_v44 }
 0x2ef   : > { %v921_v51 = vpack.c.bf16 %v4140_v19, %v4139_v1  ;;  %v667_v62 = vsel %vm651_vm9, 0.0, %v635_v35  ;;  %vm710_vm10 = vcmp.gt.f32.partialorder %v694_v52, 0.0  ;;  %vm711_vm11 = vcmp.gt.f32.partialorder %v695_v40, 0.0  ;;  %v3420_v35 = vld [vmem:[%s5655_s3 + $0x2] ss:$0 sm:$0xff] }
 0x2f0   : > { %3695 = vmatpush3.bf16.msra.mxu1 %v1257_v33  ;;  %v634_v33 = vmin.f32 %v618_v11, 0.5  ;;  %v4143_v10 = vpop.permute.xlu1 %4142  ;;  %vm683_vm13 = vcmp.eq.f32.partialorder %v667_v62, 0.5  ;;  %v726_v26 = vsel %vm710_vm10, 1.0, %v694_v52  ;;  %v5701_v44 = vpack.c.bf16 %v5006_v16, %v5003_v61 }
 0x2f1   : > { %3700 = vmatprep.subr.bf16.mxu1 %v4477_v31  ;;  %v699_v41 = vsel %vm683_vm13, 0.0, %v667_v62  ;;  %v622_v11 = vmax.f32 %v5147_v25, 0.0  ;;  %v639_v17 = vmin.f32 %v623_v63, 0.5 }
 0x2f2   : > { %vm650_vm8 = vcmp.eq.f32.partialorder %v634_v33, 0.0  ;;  %vm715_vm15 = vcmp.gt.f32.partialorder %v699_v41, 0.0 }
 0x2f3   : > { %3697 = vmatmul.mubr.msk.bf16.vlgmr.msra.gmra.mrb[40].mxu1 %vm1258_vm3, %v1067_v3  ;;  %v5698_v3 = vpack.c.bf16 %v4959_v2, %v4953_v0  ;;  %v666_v43 = vsel %vm650_vm8, 0.0, %v634_v33  ;;  %v4145_v0 = vunpack.i.h.bf16 %v4143_v10  ;;  %v4144_v2 = vunpack.i.l.bf16 %v4143_v10 }
 0x2f4   : > { %3701 = vmatpush3.bf16.msra.mxu1 %v5696_v14  ;;  %3704 = vmatprep.mubr.msk.bf16.mxu1 %vm4478_vm2, %v4477_v31  ;;  %v738_v14 = vpack.c.bf16 %v725_v53, %v724_v34  ;;  %vm682_vm12 = vcmp.eq.f32.partialorder %v666_v43, 0.5  ;;  %v731_v56 = vsel %vm715_vm15, 1.0, %v699_v41  ;;  %vm655_vm5 = vcmp.eq.f32.partialorder %v639_v17, 0.0 }
 0x2f5   : > { %3702 = vmatprep.subr.bf16.mxu1 %v4477_v31  ;;  %v923_v30 = vpack.c.bf16 %v4145_v0, %v4144_v2  ;;  %v698_v7 = vsel %vm682_vm12, 0.0, %v666_v43  ;;  %v671_v16 = vsel %vm655_vm5, 0.0, %v639_v17 }
 0x2f6   : > { %vm714_vm14 = vcmp.gt.f32.partialorder %v698_v7, 0.0  ;;  %vm687_vm0 = vcmp.eq.f32.partialorder %v671_v16, 0.5 }
 0x2f7   : > { %v730_v55 = vsel %vm714_vm14, 1.0, %v698_v7  ;;  %v703_v36 = vsel %vm687_vm0, 0.0, %v671_v16 }
 0x2f8   : > { %3703 = vmatpush3.bf16.msra.mxu1 %v917_v21  ;;  %v727_v21 = vsel %vm711_vm11, 1.0, %v695_v40  ;;  %vm719_vm7 = vcmp.gt.f32.partialorder %v703_v36, 0.0 }
 0x2f9   : > { %3708 = vmatprep.subr.bf16.mxu1 %v4477_v31  ;;  %v739_v12 = vpack.c.bf16 %v727_v21, %v726_v26  ;;  %v735_v4 = vsel %vm719_vm7, 1.0, %v703_v36 }
 0x2fb   : > { %3705 = vmatmul.mubr.msk.bf16.vlgmr.msra.gmra.mrb[20].mxu1 %vm1258_vm3, %v736_v32  ;;  %v4148_v32 = vpop.permute.xlu1 %4147 }
 0x2fc   : > { %3709 = vmatpush3.bf16.msra.mxu1 %v5697_v27  ;;  %3712 = vmatprep.mubr.msk.bf16.mxu1 %vm4478_vm2, %v4477_v31  ;;  %v4150_v15 = vunpack.i.h.bf16 %v4148_v32  ;;  %v4149_v47 = vunpack.i.l.bf16 %v4148_v32  ;;  %v741_v27 = vpack.c.bf16 %v731_v56, %v730_v55 }
 0x2fd   : > { %3710 = vmatprep.subr.bf16.mxu1 %v4477_v31 }
 0x2fe   : > { %v927_v5 = vpack.c.bf16 %v4150_v15, %v4149_v47 }
 0x2ff   : > { %v4153_v8 = vpop.permute.xlu1 %4152 }
 0x300   : > { %3711 = vmatpush3.bf16.msra.mxu1 %v919_v29  ;;  %v4155_v38 = vunpack.i.h.bf16 %v4153_v8  ;;  %v4154_v9 = vunpack.i.l.bf16 %v4153_v8  ;;  %v638_v29 = vmin.f32 %v622_v11, 0.5 }
 0x301   : > { %3716 = vmatprep.subr.bf16.mxu1 %v4477_v31 }
 0x302   : > { %v931_v45 = vpack.c.bf16 %v4155_v38, %v4154_v9  ;;  %vm654_vm4 = vcmp.eq.f32.partialorder %v638_v29, 0.0 }
 0x303   : > { %3713 = vmatmul.mubr.msk.bf16.vlgmr.msra.gmra.mrb[24].mxu1 %vm1258_vm3, %v737_v37  ;;  %v670_v20 = vsel %vm654_vm4, 0.0, %v638_v29 }
 0x304   : > { %3717 = vmatpush3.bf16.msra.mxu1 %v5698_v3  ;;  %3720 = vmatprep.mubr.msk.bf16.mxu1 %vm4478_vm2, %v4477_v31  ;;  %vm686_vm1 = vcmp.eq.f32.partialorder %v670_v20, 0.5 }
 0x305   : > { %3718 = vmatprep.subr.bf16.mxu1 %v4477_v31  ;;  %v702_v61 = vsel %vm686_vm1, 0.0, %v670_v20 }
 0x306   : > { %vm718_vm6 = vcmp.gt.f32.partialorder %v702_v61, 0.0 }
 0x307   : > { %v734_v37 = vsel %vm718_vm6, 1.0, %v702_v61 }
 0x308   : > { %3719 = vmatpush3.bf16.msra.mxu1 %v921_v51  ;;  %v743_v6 = vpack.c.bf16 %v735_v4, %v734_v37 }
 0x309   : > { %3724 = vmatprep.subr.bf16.mxu1 %v4477_v31 }
 0x30b   : > { %3721 = vmatmul.mubr.msk.bf16.vlgmr.msra.gmra.mrb[28].mxu1 %vm1258_vm3, %v738_v14 }
 0x30c   : > { %3725 = vmatpush3.bf16.msra.mxu1 %v5699_v23  ;;  %3728 = vmatprep.mubr.msk.bf16.mxu1 %vm4478_vm2, %v4477_v31 }
 0x30d   : > { %3726 = vmatprep.subr.bf16.mxu1 %v4477_v31 }
 0x310   : > { %3727 = vmatpush3.bf16.msra.mxu1 %v923_v30 }
 0x311   : > { %3740 = vmatprep.subr.bf16.mxu1 %v4477_v31 }
 0x313   : > { %3729 = vmatmul.mubr.msk.bf16.vlgmr.msra.gmra.mrb[32].mxu1 %vm1258_vm3, %v739_v12 }
 0x314   : > { %3741 = vmatpush3.bf16.msra.mxu1 %v5700_v49  ;;  %3744 = vmatprep.mubr.msk.bf16.mxu1 %vm4478_vm2, %v4477_v31 }
 0x315   : > { %3742 = vmatprep.subr.bf16.mxu1 %v4477_v31 }
 0x318   : > { %3743 = vmatpush3.bf16.msra.mxu1 %v927_v5 }
 0x319   : > { %3756 = vmatprep.subr.bf16.mxu1 %v4477_v31 }
 0x31b   : > { %3745 = vmatmul.mubr.msk.bf16.vlgmr.msra.gmra.mrb[36].mxu1 %vm1258_vm3, %v741_v27 }
 0x31c   : > { %3757 = vmatpush3.bf16.msra.mxu1 %v5701_v44  ;;  %3760 = vmatprep.mubr.msk.bf16.mxu1 %vm4478_vm2, %v4477_v31 }
 0x31d   : > { %3758 = vmatprep.subr.bf16.mxu1 %v4477_v31 }
 0x320   : > { %3759 = vmatpush3.bf16.msra.mxu1 %v931_v45 }
 0x321   : > { %3782 = vmatprep.subr.bf16.mxu1 %v4477_v31 }
 0x323   : > { %3761 = vmatmul.mubr.msk.bf16.vlgmr.msra.gmra.mrb[40].mxu1 %vm1258_vm3, %v743_v6 }
 0x324   : > { %3786 = vmatprep.mubr.msk.bf16.mxu1 %vm4478_vm2, %v4477_v31 }
 0x3a2   : > { %v3768_v33 = vpop.f32.mrb[36].mxu0 }
 0x3a3   : > { %v2146_v19 = vpop.f32.mrb[37].mxu0  ;;  %v5264_v3 = vadd.f32 %v3768_v33, %v3420_v35 }
 0x3a4   : > { %v3769_v1 = vpop.f32.mrb[38].mxu0  ;;  %v2147_v51 = vadd.f32 %v3420_v35, %v2146_v19 }
 0x3a5   : > { %v5266_v34 = vadd.f32 %v3769_v1, %v3420_v35  ;;  %v2149_v53 = vpop.f32.mrb[39].mxu0  ;;  %v1964_v1 = vmax.f32 %v5064_v60, 1.0  ;;  %v4282_v60 = vld [vmem:[%s4739_s24 + $0x40] sm:$0xff] }
 0x3a6   : > { %v2150_v52 = vadd.f32 %v3420_v35, %v2149_v53 }
 0x3a7   : > { %v4161_v40 = vpack.i.bf16 %v5266_v34, %v5264_v3  ;;  %v2275_v10 = vpack.c.bf16 %v5266_v34, %v5264_v3  ;;  %v1974_v3 = vmax.f32 %v5129_v18, 1.0 }
 0x3a8   : > { %v4156_v14 = vpack.i.bf16 %v2150_v52, %v2147_v51  ;;  %v2273_v43 = vpack.c.bf16 %v2150_v52, %v2147_v51  ;;  %v1980_v51 = vmin.f32 %v1964_v1, 1e+10  ;;  %v1965_v52 = vmax.f32 %v5077_v24, 1.0  ;;  %v4283_v24 = vld [vmem:[%s4739_s24 + $0x48] sm:$0xff] }
 0x3aa   : > { %v3772_v62 = vpop.f32.mrb[40].mxu0  ;;  %4157 = vrot.lane.b32.xlu1 %v4156_v14, %s4479_s25  ;;  %3783 = vmatpush3.bf16.msra.mxu1 %v2273_v43  ;;  %vm1996_vm9 = vcmp.eq.f32.partialorder %v1980_v51, 1.0 }
 0x3ab   : > { %v2162_v0 = vpop.f32.mrb[41].mxu0  ;;  %3784 = vmatprep.subr.bf16.mxu1 %v4477_v31  ;;  %v5274_v23 = vadd.f32 %v3772_v62, %v3420_v35  ;;  %v2012_v43 = vsel %vm1996_vm9, 0.0, %v1980_v51  ;;  %v1981_v62 = vmin.f32 %v1965_v52, 1e+10  ;;  %v4284_v51 = vld [vmem:[%s4739_s24 + $0x60] sm:$0xff] }
 0x3ac   : > { %v3773_v2 = vpop.f32.mrb[42].mxu0  ;;  %v5278_v30 = vadd.f32 %v3420_v35, %v2162_v0  ;;  %vm2028_vm11 = vcmp.eq.f32.partialorder %v2012_v43, 1e+10  ;;  %v1975_v52 = vmax.f32 %v4284_v51, 1.0  ;;  %v1978_v51 = vmax.f32 %v5150_v42, 1.0 }
 0x3ad   : > { %v5276_v26 = vadd.f32 %v3773_v2, %v3420_v35  ;;  %v2165_v21 = vpop.f32.mrb[43].mxu0  ;;  %v1967_v2 = vmax.f32 %v5093_v22, 1.0  ;;  %vm1997_vm12 = vcmp.eq.f32.partialorder %v1981_v62, 1.0  ;;  %v1969_v22 = vmax.f32 %v5112_v57, 1.0 }
 0x3ae   : > { %v5280_v7 = vadd.f32 %v3420_v35, %v2165_v21  ;;  %4162 = vrot.lane.b32.xlu1 %v4161_v40, %s4479_s25  ;;  %v1966_v40 = vmax.f32 %v5080_v13, 1.0  ;;  %v1971_v21 = vmax.f32 %v4282_v60, 1.0  ;;  %v2044_v13 = vsel %vm2028_vm11, 0.0, %v2012_v43 }
 0x3af   : > { %v4171_v41 = vpack.i.bf16 %v5276_v26, %v5274_v23  ;;  %v2279_v32 = vpack.c.bf16 %v5276_v26, %v5274_v23  ;;  %vm2060_vm15 = vcmp.gt.f32.partialorder %v2044_v13, 0.0  ;;  %v1994_v42 = vmin.f32 %v1978_v51, 1e+10 }
 0x3b0   : > { %v4166_v12 = vpack.i.bf16 %v5280_v7, %v5278_v30  ;;  %v2277_v15 = vpack.c.bf16 %v5280_v7, %v5278_v30  ;;  %v1982_v0 = vmin.f32 %v1966_v40, 1e+10  ;;  %v4285_v40 = vld [vmem:[%s4739_s24 + $0x68] sm:$0xff]  ;;  %s2657_s24 = sld [smem:[#allocation10]] }
 0x3b1   : > { %v1976_v57 = vmax.f32 %v4285_v40, 1.0 }
 0x3b2   : > { %v3776_v47 = vpop.f32.mrb[44].mxu0  ;;  %4167 = vrot.lane.b32.xlu1 %v4166_v12, %s4479_s25  ;;  %vm1998_vm13 = vcmp.eq.f32.partialorder %v1982_v0, 1.0 }
 0x3b3   : > { %v2178_v49 = vpop.f32.mrb[45].mxu0  ;;  %v5292_v56 = vadd.f32 %v3776_v47, %v3420_v35  ;;  %v1983_v47 = vmin.f32 %v1967_v2, 1e+10  ;;  %v1992_v2 = vmin.f32 %v1976_v57, 1e+10 }
 0x3b4   : > { %v3777_v55 = vpop.f32.mrb[46].mxu0  ;;  %v2179_v27 = vadd.f32 %v3420_v35, %v2178_v49  ;;  %v2013_v49 = vsel %vm1997_vm12, 0.0, %v1981_v62 }
 0x3b5   : > { %v5294_v5 = vadd.f32 %v3777_v55, %v3420_v35  ;;  %v2181_v8 = vpop.f32.mrb[47].mxu0  ;;  %v2014_v55 = vsel %vm1998_vm13, 0.0, %v1982_v0  ;;  %vm2029_vm4 = vcmp.eq.f32.partialorder %v2013_v49, 1e+10  ;;  %vm1999_vm1 = vcmp.eq.f32.partialorder %v1983_v47, 1.0 }
 0x3b6   : > { %v2182_v38 = vadd.f32 %v3420_v35, %v2181_v8  ;;  %4172 = vrot.lane.b32.xlu1 %v4171_v41, %s4479_s25  ;;  %v1972_v41 = vmax.f32 %v4283_v24, 1.0  ;;  %vm2030_vm5 = vcmp.eq.f32.partialorder %v2014_v55, 1e+10 }
 0x3b7   : > { %v4181_v9 = vpack.i.bf16 %v5294_v5, %v5292_v56  ;;  %v2283_v44 = vpack.c.bf16 %v5294_v5, %v5292_v56 }
 0x3b8   : > { %v4176_v45 = vpack.i.bf16 %v2182_v38, %v2179_v27  ;;  %v2281_v11 = vpack.c.bf16 %v2182_v38, %v2179_v27  ;;  %v1987_v27 = vmin.f32 %v1971_v21, 1e+10  ;;  %v1988_v38 = vmin.f32 %v1972_v41, 1e+10 }
 0x3ba   : > { %v3780_v63 = vpop.f32.mrb[48].mxu0  ;;  %3815 = vmatpush3.bf16.msra.mxu0 %v2281_v11  ;;  %4177 = vrot.lane.b32.xlu1 %v4176_v45, %s4479_s25  ;;  %vm2003_vm6 = vcmp.eq.f32.partialorder %v1987_v27, 1.0  ;;  %vm2004_vm7 = vcmp.eq.f32.partialorder %v1988_v38, 1.0  ;;  %v2045_v11 = vsel %vm2029_vm4, 0.0, %v2013_v49 }
 0x3bb   : > { %v2194_v29 = vpop.f32.mrb[49].mxu0  ;;  %3816 = vmatprep.subr.bf16.mxu0 %v4477_v31  ;;  %v5303_v20 = vadd.f32 %v3780_v63, %v3420_v35  ;;  %v2046_v63 = vsel %vm2030_vm5, 0.0, %v2014_v55  ;;  %v2020_v1 = vsel %vm2004_vm7, 0.0, %v1988_v38  ;;  %vm2008_vm5 = vcmp.eq.f32.partialorder %v1992_v2, 1.0 }
 0x3bc   : > { %v3781_v17 = vpop.f32.mrb[50].mxu0  ;;  %v5307_v36 = vadd.f32 %v3420_v35, %v2194_v29  ;;  %v2015_v29 = vsel %vm1999_vm1, 0.0, %v1983_v47  ;;  %vm2062_vm9 = vcmp.gt.f32.partialorder %v2046_v63, 0.0  ;;  %vm2036_vm13 = vcmp.eq.f32.partialorder %v2020_v1, 1e+10 }
 0x3bd   : > { %v5305_v16 = vadd.f32 %v3781_v17, %v3420_v35  ;;  %v2197_v61 = vpop.f32.mrb[51].mxu0  ;;  %v1970_v17 = vmax.f32 %v5115_v58, 1.0  ;;  %v1991_v58 = vmin.f32 %v1975_v52, 1e+10  ;;  %v2078_v41 = vsel %vm2062_vm9, 1.0, %v2046_v63 }
 0x3be   : > { %v5309_v37 = vadd.f32 %v3420_v35, %v2197_v61  ;;  %4182 = vrot.lane.b32.xlu1 %v4181_v9, %s4479_s25  ;;  %v1963_v35 = vmax.f32 %v5061_v28, 1.0  ;;  %v1968_v28 = vmax.f32 %v5096_v39, 1.0  ;;  %v2076_v9 = vsel %vm2060_vm15, 1.0, %v2044_v13 }
 0x3bf   : > { %v4191_v4 = vpack.i.bf16 %v5305_v16, %v5303_v20  ;;  %v2287_v6 = vpack.c.bf16 %v5305_v16, %v5303_v20  ;;  %v1986_v0 = vmin.f32 %v1970_v17, 1e+10  ;;  %v2052_v49 = vsel %vm2036_vm13, 0.0, %v2020_v1 }
 0x3c0   : > { %v4186_v33 = vpack.i.bf16 %v5309_v37, %v5307_v36  ;;  %v2285_v19 = vpack.c.bf16 %v5309_v37, %v5307_v36  ;;  %v1979_v53 = vmin.f32 %v1963_v35, 1e+10  ;;  %v1984_v8 = vmin.f32 %v1968_v28, 1e+10 }
 0x3c1   : > { %v2019_v35 = vsel %vm2003_vm6, 0.0, %v1987_v27  ;;  %vm2002_vm15 = vcmp.eq.f32.partialorder %v1986_v0, 1.0  ;;  %vm2007_vm4 = vcmp.eq.f32.partialorder %v1991_v58, 1.0  ;;  %vm2068_vm7 = vcmp.gt.f32.partialorder %v2052_v49, 0.0 }
 0x3c2   : > { %4187 = vrot.lane.b32.xlu1 %v4186_v33, %s4479_s25  ;;  %vm1995_vm8 = vcmp.eq.f32.partialorder %v1979_v53, 1.0  ;;  %vm2000_vm0 = vcmp.eq.f32.partialorder %v1984_v8, 1.0  ;;  %vm2035_vm12 = vcmp.eq.f32.partialorder %v2019_v35, 1e+10 }
 0x3c3   : > { %v2011_v14 = vsel %vm1995_vm8, 0.0, %v1979_v53  ;;  %v2016_v33 = vsel %vm2000_vm0, 0.0, %v1984_v8  ;;  %v1985_v53 = vmin.f32 %v1969_v22, 1e+10  ;;  %vm2061_vm8 = vcmp.gt.f32.partialorder %v2045_v11, 0.0 }
 0x3c4   : > { %vm2027_vm10 = vcmp.eq.f32.partialorder %v2011_v14, 1e+10  ;;  %vm2032_vm11 = vcmp.eq.f32.partialorder %v2016_v33, 1e+10  ;;  %v2077_v24 = vsel %vm2061_vm8, 1.0, %v2045_v11  ;;  %v2051_v47 = vsel %vm2035_vm12, 0.0, %v2019_v35 }
 0x3c5   : > { %v2043_v12 = vsel %vm2027_vm10, 0.0, %v2011_v14  ;;  %vm2031_vm10 = vcmp.eq.f32.partialorder %v2015_v29, 1e+10  ;;  %v2048_v13 = vsel %vm2032_vm11, 0.0, %v2016_v33  ;;  %v1973_v8 = vmax.f32 %v5126_v59, 1.0 }
 0x3c6   : > { %4192 = vrot.lane.b32.xlu1 %v4191_v4, %s4479_s25  ;;  %vm2059_vm14 = vcmp.gt.f32.partialorder %v2043_v12, 0.0  ;;  %v2092_v38 = vpack.c.bf16 %v2078_v41, %v2077_v24  ;;  %vm2064_vm0 = vcmp.gt.f32.partialorder %v2048_v13, 0.0  ;;  %vm2067_vm6 = vcmp.gt.f32.partialorder %v2051_v47, 0.0  ;;  %s3459_s25 = sshll.u32 %s4556_s13, 9  ;;  %s4482_s13 = smov [#allocation11]  }
 0x3c7   : > { %v2075_v39 = vsel %vm2059_vm14, 1.0, %v2043_v12  ;;  %vm2001_vm14 = vcmp.eq.f32.partialorder %v1985_v53, 1.0  ;;  %v2047_v12 = vsel %vm2031_vm10, 0.0, %v2015_v29  ;;  %v2023_v22 = vsel %vm2007_vm4, 0.0, %v1991_v58  ;;  %s5608_s17 = scalar_lea.hbm %s5661_s9, %s3459_s25 }
 0x3c8   : > { %v2091_v43 = vpack.c.bf16 %v2076_v9, %v2075_v39  ;;  %v2017_v55 = vsel %vm2001_vm14, 0.0, %v1985_v53  ;;  %vm2063_vm1 = vcmp.gt.f32.partialorder %v2047_v12, 0.0  ;;  %v2024_v39 = vsel %vm2008_vm5, 0.0, %v1992_v2 }
 0x3c9   : > { %vm2033_vm8 = vcmp.eq.f32.partialorder %v2017_v55, 1e+10  ;;  %v1989_v9 = vmin.f32 %v1973_v8, 1e+10  ;;  %v1990_v59 = vmin.f32 %v1974_v3, 1e+10 }
 0x3ca   : > { %v2079_v11 = vsel %vm2063_vm1, 1.0, %v2047_v12  ;;  %v2080_v63 = vsel %vm2064_vm0, 1.0, %v2048_v13  ;;  %v2083_v17 = vsel %vm2067_vm6, 1.0, %v2051_v47  ;;  %vm2039_vm10 = vcmp.eq.f32.partialorder %v2023_v22, 1e+10 }
 0x3cb   : > { %vm2040_vm11 = vcmp.eq.f32.partialorder %v2024_v39, 1e+10  ;;  %v2049_v35 = vsel %vm2033_vm8, 0.0, %v2017_v55  ;;  %vm2005_vm12 = vcmp.eq.f32.partialorder %v1989_v9, 1.0  ;;  %vm2006_vm13 = vcmp.eq.f32.partialorder %v1990_v59, 1.0 }
 0x3cc   : > { %v1977_v53 = vmax.f32 %v5147_v25, 1.0  ;;  %v2055_v57 = vsel %vm2039_vm10, 0.0, %v2023_v22  ;;  %v2056_v30 = vsel %vm2040_vm11, 0.0, %v2024_v39  ;;  %vm2065_vm14 = vcmp.gt.f32.partialorder %v2049_v35, 0.0 }
 0x3cd   : > { %vm2071_vm4 = vcmp.gt.f32.partialorder %v2055_v57, 0.0  ;;  %vm2072_vm5 = vcmp.gt.f32.partialorder %v2056_v30, 0.0 }
 0x3ce   : > { %v1993_v25 = vmin.f32 %v1977_v53, 1e+10  ;;  %v2087_v41 = vsel %vm2071_vm4, 1.0, %v2055_v57  ;;  %v2088_v12 = vsel %vm2072_vm5, 1.0, %v2056_v30  ;;  %v4279_v57 = vld [vmem:[#allocation9 + $0x18] sm:$0xff]  }
 0x3cf   : > { %v2097_v36 = vpack.c.bf16 %v2088_v12, %v2087_v41 }
 0x3d0   : > { %vm2009_vm6 = vcmp.eq.f32.partialorder %v1993_v25, 1.0 }
 0x3d1   : > { %v2025_v37 = vsel %vm2009_vm6, 0.0, %v1993_v25 }
 0x3d2   : > { %vm2041_vm10 = vcmp.eq.f32.partialorder %v2025_v37, 1e+10 }
 0x41c   : > { %v4158_v45 = vpop.permute.xlu1 %4157 }
 0x41d   : > { %v4160_v61 = vunpack.i.h.bf16 %v4158_v45  ;;  %v4159_v4 = vunpack.i.l.bf16 %v4158_v45 }
 0x41f   : > { %v2274_v14 = vpack.c.bf16 %v4160_v61, %v4159_v4  ;;  %v2084_v61 = vsel %vm2068_vm7, 1.0, %v2052_v49  ;;  %vm2010_vm7 = vcmp.eq.f32.partialorder %v1994_v42, 1.0 }
 0x420   : > { %v4163_v62 = vpop.permute.xlu1 %4162 }
 0x421   : > { %3785 = vmatpush3.bf16.msra.mxu1 %v2274_v14  ;;  %v4165_v28 = vunpack.i.h.bf16 %v4163_v62  ;;  %v4164_v60 = vunpack.i.l.bf16 %v4163_v62  ;;  %v2095_v14 = vpack.c.bf16 %v2084_v61, %v2083_v17  ;;  %v2022_v62 = vsel %vm2006_vm13, 0.0, %v1990_v59  ;;  %v4277_v17 = vld [vmem:[#allocation9 + $0x8] sm:$0xff]  }
 0x422   : > { %3790 = vmatprep.subr.bf16.mxu1 %v4477_v31  ;;  %vm2038_vm0 = vcmp.eq.f32.partialorder %v2022_v62, 1e+10 }
 0x423   : > { %v2276_v34 = vpack.c.bf16 %v4165_v28, %v4164_v60  ;;  %v2081_v28 = vsel %vm2065_vm14, 1.0, %v2049_v35  ;;  %v2054_v26 = vsel %vm2038_vm0, 0.0, %v2022_v62 }
 0x424   : > { %v4168_v21 = vpop.permute.xlu1 %4167  ;;  %3787 = vmatmul.mubr.msk.bf16.vlgmr.msra.gmra.mrb[20].mxu1 %vm1258_vm3, %v2091_v43  ;;  %v2021_v43 = vsel %vm2005_vm12, 0.0, %v1989_v9 }
 0x425   : > { %3791 = vmatpush3.bf16.msra.mxu1 %v2275_v10  ;;  %3794 = vmatprep.mubr.msk.bf16.mxu1 %vm4478_vm2, %v4477_v31  ;;  %v2018_v10 = vsel %vm2002_vm15, 0.0, %v1986_v0  ;;  %v4170_v45 = vunpack.i.h.bf16 %v4168_v21  ;;  %v4169_v18 = vunpack.i.l.bf16 %v4168_v21  ;;  %vm2037_vm1 = vcmp.eq.f32.partialorder %v2021_v43, 1e+10 }
 0x426   : > { %3792 = vmatprep.subr.bf16.mxu1 %v4477_v31  ;;  %vm2034_vm9 = vcmp.eq.f32.partialorder %v2018_v10, 1e+10  ;;  %v2053_v23 = vsel %vm2037_vm1, 0.0, %v2021_v43  ;;  %v4280_v43 = vld [vmem:[#allocation9 + $0x20] sm:$0xff]  }
 0x427   : > { %v2050_v1 = vsel %vm2034_vm9, 0.0, %v2018_v10  ;;  %v2278_v52 = vpack.c.bf16 %v4170_v45, %v4169_v18  ;;  %vm2069_vm8 = vcmp.gt.f32.partialorder %v2053_v23, 0.0  ;;  %vm2070_vm9 = vcmp.gt.f32.partialorder %v2054_v26, 0.0  ;;  %v4276_v45 = vld [vmem:[#allocation9] sm:$0xff]  }
 0x428   : > { %v5351_v27 = vpop.permute.xlu1 %4172  ;;  %vm2066_vm15 = vcmp.gt.f32.partialorder %v2050_v1, 0.0  ;;  %v2085_v8 = vsel %vm2069_vm8, 1.0, %v2053_v23  ;;  %v2086_v3 = vsel %vm2070_vm9, 1.0, %v2054_v26  ;;  %v2057_v10 = vsel %vm2041_vm10, 0.0, %v2025_v37 }
 0x429   : > { %3793 = vmatpush3.bf16.msra.mxu1 %v2276_v34  ;;  %v4175_v0 = vunpack.i.h.bf16 %v5351_v27  ;;  %v4174_v58 = vunpack.i.l.bf16 %v5351_v27  ;;  %v2082_v60 = vsel %vm2066_vm15, 1.0, %v2050_v1  ;;  %v2096_v22 = vpack.c.bf16 %v2086_v3, %v2085_v8 }
 0x42a   : > { %3798 = vmatprep.subr.bf16.mxu1 %v4477_v31  ;;  %vm2073_vm12 = vcmp.gt.f32.partialorder %v2057_v10, 0.0  ;;  %v5406_v18 = vstv %s2657_s24  ;;  %s4389_s24 = scalar_lea.vmem %s5603_s18, 512 }
 0x42b   : > { %v2280_v13 = vpack.c.bf16 %v4175_v0, %v4174_v58  ;;  %v2089_v5 = vsel %vm2073_vm12, 1.0, %v2057_v10  ;;  %p4390_p8 = scmp.ne.s32.totalorder %s5603_s18, %s4389_s24 }
 0x42c   : > { %v4178_v29 = vpop.permute.xlu1 %4177  ;;  %3795 = vmatmul.mubr.msk.bf16.vlgmr.msra.gmra.mrb[24].mxu1 %vm1258_vm3, %v2092_v38 }
 0x42d   : > { %v4180_v4 = vunpack.i.h.bf16 %v4178_v29  ;;  %v4179_v33 = vunpack.i.l.bf16 %v4178_v29  ;;  %3799 = vmatpush3.bf16.msra.mxu1 %v2277_v15  ;;  %3802 = vmatprep.mubr.msk.bf16.mxu1 %vm4478_vm2, %v4477_v31  ;;  %v2093_v15 = vpack.c.bf16 %v2080_v63, %v2079_v11  ;;  %p4391_p13 = pnand %p4390_p8, %p4636_p7 }
 0x42e   : > { %3800 = vmatprep.subr.bf16.mxu1 %v4477_v31 }
 0x42f   : > { %v2282_v40 = vpack.c.bf16 %v4180_v4, %v4179_v33  ;;  %v4278_v4 = vld [vmem:[#allocation9 + $0x10] sm:$0xff]   ;;  %p4392_p4 = pneg %p4391_p13 }
 0x430   : > { %v4183_v7 = vpop.permute.xlu1 %4182 }
 0x431   : > { %3801 = vmatpush3.bf16.msra.mxu1 %v2278_v52  ;;  %3817 = vmatpush3.bf16.msra.mxu0 %v2282_v40  ;;  %v4185_v49 = vunpack.i.h.bf16 %v4183_v7  ;;  %v4184_v55 = vunpack.i.l.bf16 %v4183_v7 }
 0x432   : > { %3806 = vmatprep.subr.bf16.mxu1 %v4477_v31  ;;  %3830 = vmatprep.subr.bf16.mxu0 %v4477_v31 }
 0x433   : > { %v2284_v34 = vpack.c.bf16 %v4185_v49, %v4184_v55 }
 0x434   : > { %v4188_v2 = vpop.permute.xlu1 %4187  ;;  %3803 = vmatmul.mubr.msk.bf16.vlgmr.msra.gmra.mrb[28].mxu1 %vm1258_vm3, %v2093_v15  ;;  %3819 = vmatmul.mubr.msk.bf16.vlgmr.msra.gmra.mrb[28].mxu0 %vm1258_vm3, %v2095_v14 }
 0x435   : > { %v4190_v21 = vunpack.i.h.bf16 %v4188_v2  ;;  %v4189_v24 = vunpack.i.l.bf16 %v4188_v2  ;;  %3807 = vmatpush3.bf16.msra.mxu1 %v2279_v32  ;;  %3831 = vmatpush3.bf16.msra.mxu0 %v2285_v19  ;;  %v2094_v32 = vpack.c.bf16 %v2082_v60, %v2081_v28  ;;  %v2026_v19 = vsel %vm2010_vm7, 0.0, %v1994_v42 }
 0x436   : > { %3808 = vmatprep.subr.bf16.mxu1 %v4477_v31  ;;  %3832 = vmatprep.subr.bf16.mxu0 %v4477_v31  ;;  %vm2042_vm11 = vcmp.eq.f32.partialorder %v2026_v19, 1e+10 }
 0x437   : > { %v2286_v47 = vpack.c.bf16 %v4190_v21, %v4189_v24  ;;  %3810 = vmatprep.mubr.msk.bf16.mxu1 %vm4478_vm2, %v4477_v31  ;;  %3834 = vmatprep.mubr.msk.bf16.mxu0 %vm4478_vm2, %v4477_v31  ;;  %v2058_v27 = vsel %vm2042_vm11, 0.0, %v2026_v19 }
 0x438   : > { %v4193_v38 = vpop.permute.xlu1 %4192  ;;  %vm2074_vm13 = vcmp.gt.f32.partialorder %v2058_v27, 0.0 }
 0x439   : > { %3809 = vmatpush3.bf16.msra.mxu1 %v2280_v13  ;;  %3833 = vmatpush3.bf16.msra.mxu0 %v2286_v47  ;;  %v4195_v39 = vunpack.i.h.bf16 %v4193_v38  ;;  %v4194_v56 = vunpack.i.l.bf16 %v4193_v38  ;;  %v4281_v47 = vld [vmem:[#allocation9 + $0x28] sm:$0xff]  }
 0x43a   : > { %3822 = vmatprep.subr.bf16.mxu1 %v4477_v31  ;;  %3846 = vmatprep.subr.bf16.mxu0 %v4276_v45 }
 0x43b   : > { %v2288_v9 = vpack.c.bf16 %v4195_v39, %v4194_v56 }
 0x43c   : > { %3811 = vmatmul.mubr.msk.bf16.vlgmr.msra.gmra.mrb[32].mxu1 %vm1258_vm3, %v2094_v32  ;;  %3835 = vmatmul.mubr.msk.bf16.vlgmr.msra.gmra.mrb[32].mxu0 %vm1258_vm3, %v2097_v36 }
 0x43d   : > { %3823 = vmatpush3.bf16.msra.mxu1 %v2283_v44  ;;  %3826 = vmatprep.mubr.msk.bf16.mxu1 %vm4478_vm2, %v4477_v31  ;;  %v2090_v44 = vsel %vm2074_vm13, 1.0, %v2058_v27 }
 0x43e   : > { %3824 = vmatprep.subr.bf16.mxu1 %v4477_v31  ;;  %v2098_v59 = vpack.c.bf16 %v2090_v44, %v2089_v5  ;;  %3847 = vmatpush3.bf16.msra.mxu0 %v4276_v45 }
 0x43f   : > { %3848 = vmatprep.subr.bf16.mxu0 %v4277_v17 }
 0x441   : > { %3825 = vmatpush3.bf16.msra.mxu1 %v2284_v34 }
 0x442   : > { %3838 = vmatprep.subr.bf16.mxu1 %v4477_v31  ;;  %3849 = vmatpush3.bf16.msra.mxu0 %v4277_v17 }
 0x443   : > { %3850 = vmatprep.subr.bf16.mxu0 %v4278_v4 }
 0x444   : > { %3827 = vmatmul.mubr.msk.bf16.vlgmr.msra.gmra.mrb[36].mxu1 %vm1258_vm3, %v2096_v22 }
 0x445   : > { %3839 = vmatpush3.bf16.msra.mxu1 %v2287_v6  ;;  %3842 = vmatprep.mubr.msk.bf16.mxu1 %vm4478_vm2, %v4477_v31 }
 0x446   : > { %3840 = vmatprep.subr.bf16.mxu1 %v4477_v31  ;;  %3851 = vmatpush3.bf16.msra.mxu0 %v4278_v4 }
 0x447   : > { %3852 = vmatprep.subr.bf16.mxu0 %v4279_v57 }
 0x449   : > { %3841 = vmatpush3.bf16.msra.mxu1 %v2288_v9 }
 0x44a   : > { %3853 = vmatpush3.bf16.msra.mxu0 %v4279_v57 }
 0x44b   : > { %3854 = vmatprep.subr.bf16.mxu0 %v4280_v43 }
 0x44c   : > { %3843 = vmatmul.mubr.msk.bf16.vlgmr.msra.gmra.mrb[40].mxu1 %vm1258_vm3, %v2098_v59 }
 0x44e   : > { %3855 = vmatpush3.bf16.msra.mxu0 %v4280_v43 }
 0x44f   : > { %3856 = vmatprep.subr.bf16.mxu0 %v4281_v47 }
 0x452   : > { %3857 = vmatpush3.bf16.msra.mxu0 %v4281_v47 }
 0x4f7   : > { %v2326_v20 = vpop.f32.mrb[20].mxu1 }
 0x4f8   : > { %vm2658_vm14 = vcmp.ge.f32.partialorder %v2326_v20, 0.0  ;;  %v2675_v16 = vmul.f32 %v5406_v18, %v2326_v20  ;;  %v3788_v6 = vpop.f32.mrb[21].mxu1 }
 0x4f9   : > { %v2329_v11 = vpop.f32.mrb[22].mxu1 }
 0x4fa   : > { %v2691_v63 = vsel %vm2658_vm14, %v2326_v20, %v2675_v16  ;;  %vm2659_vm2 = vcmp.ge.f32.partialorder %v2329_v11, 0.0  ;;  %v2676_v31 = vmul.f32 %v5406_v18, %v2329_v11  ;;  %v3789_v29 = vpop.f32.mrb[23].mxu1 }
 0x4fb   : > { %2713 = vst.msk [vmem:[#allocation2 + $0x10] sm:$0xff] %vm1258_vm3, %v2691_v63 }
 0x4fc   : > { %v2692_v61 = vsel %vm2659_vm2, %v2329_v11, %v2676_v31  ;;  %vm2922_vm2 = vcmask 523264  }
 0x4fd   : > { %2714 = vst.msk [vmem:[#allocation2 + $0x18] sm:$0xff] %vm1258_vm3, %v2692_v61 }
 0x4ff   : > { %v2370_v33 = vpop.f32.mrb[24].mxu1 }
 0x500   : > { %vm2660_vm15 = vcmp.ge.f32.partialorder %v2370_v33, 0.0  ;;  %v2677_v35 = vmul.f32 %v5406_v18, %v2370_v33  ;;  %v3796_v1 = vpop.f32.mrb[25].mxu1 }
 0x501   : > { %v2373_v53 = vpop.f32.mrb[26].mxu1 }
 0x502   : > { %v2693_v51 = vsel %vm2660_vm15, %v2370_v33, %v2677_v35  ;;  %vm2661_vm4 = vcmp.ge.f32.partialorder %v2373_v53, 0.0  ;;  %v2678_v52 = vmul.f32 %v5406_v18, %v2373_v53  ;;  %v3797_v40 = vpop.f32.mrb[27].mxu1  ;;  %v5415_v7 = vld [vmem:[#allocation2 + $0x10] sm:$0xff]  ;;  %vm3002_vm15 = vcmask 785408  }
 0x503   : > { %2715 = vst.msk [vmem:[#allocation2 + $0x20] sm:$0xff] %vm1258_vm3, %v2693_v51 }
 0x504   : > { %v2694_v30 = vsel %vm2661_vm4, %v2373_v53, %v2678_v52  ;;  %v5417_v15 = vld [vmem:[#allocation2 + $0x18] sm:$0xff] }
 0x505   : > { %2716 = vst.msk [vmem:[#allocation2 + $0x28] sm:$0xff] %vm1258_vm3, %v2694_v30  ;;  %v4196_v14 = vpack.i.bf16 %v5417_v15, %v5415_v7 }
 0x507   : > { %v2502_v62 = vpop.f32.mrb[28].mxu0  ;;  %4197 = vrot.lane.b32.xlu1 %v4196_v14, %s4480_s20  ;;  %v2414_v25 = vpop.f32.mrb[28].mxu1 }
 0x508   : > { %vm2666_vm5 = vcmp.ge.f32.partialorder %v2502_v62, 0.0  ;;  %v2683_v42 = vmul.f32 %v5406_v18, %v2502_v62  ;;  %vm2662_vm1 = vcmp.ge.f32.partialorder %v2414_v25, 0.0  ;;  %v2679_v0 = vmul.f32 %v5406_v18, %v2414_v25  ;;  %v3804_v58 = vpop.f32.mrb[29].mxu1  ;;  %v3820_v2 = vpop.f32.mrb[29].mxu0 }
 0x509   : > { %v2417_v28 = vpop.f32.mrb[30].mxu1  ;;  %v2505_v60 = vpop.f32.mrb[30].mxu0 }
 0x50a   : > { %v2699_v21 = vsel %vm2666_vm5, %v2502_v62, %v2683_v42  ;;  %v2695_v24 = vsel %vm2662_vm1, %v2414_v25, %v2679_v0  ;;  %vm2663_vm0 = vcmp.ge.f32.partialorder %v2417_v28, 0.0  ;;  %v2680_v41 = vmul.f32 %v5406_v18, %v2417_v28  ;;  %v3805_v12 = vpop.f32.mrb[31].mxu1  ;;  %v3821_v13 = vpop.f32.mrb[31].mxu0  ;;  %v5429_v32 = vld [vmem:[#allocation2 + $0x20] sm:$0xff] }
 0x50b   : > { %2721 = vst.msk [vmem:[#allocation2 + $0x50] sm:$0xff] %vm1258_vm3, %v2699_v21  ;;  %2717 = vst.msk [vmem:[#allocation2 + $0x30] sm:$0xff] %vm1258_vm3, %v2695_v24  ;;  %vm2667_vm6 = vcmp.ge.f32.partialorder %v2505_v60, 0.0  ;;  %v2684_v23 = vmul.f32 %v5406_v18, %v2505_v60  ;;  %v2776_v24 = vld [vmem:[#allocation2 + $0x90] sm:$0xff]  ;;  %v2777_v13 = vld [vmem:[#allocation2 + $0x98] sm:$0xff] }
 0x50c   : > { %v2696_v26 = vsel %vm2663_vm0, %v2417_v28, %v2680_v41  ;;  %v5431_v36 = vld [vmem:[#allocation2 + $0x28] sm:$0xff] }
 0x50d   : > { %2718 = vst.msk [vmem:[#allocation2 + $0x38] sm:$0xff] %vm1258_vm3, %v2696_v26  ;;  %v2700_v37 = vsel %vm2667_vm6, %v2505_v60, %v2684_v23  ;;  %v4201_v19 = vpack.i.bf16 %v5431_v36, %v5429_v32  ;;  %v4271_v23 = vpack.i.bf16 %v2777_v13, %v2776_v24 }
 0x50e   : > { %2722 = vst.msk [vmem:[#allocation2 + $0x58] sm:$0xff] %vm1258_vm3, %v2700_v37 }
 0x50f   : > { %v2590_v49 = vpop.f32.mrb[32].mxu0  ;;  %4202 = vrot.lane.b32.xlu1 %v4201_v19, %s4480_s20  ;;  %v2458_v55 = vpop.f32.mrb[32].mxu1 }
 0x510   : > { %vm2670_vm7 = vcmp.ge.f32.partialorder %v2590_v49, 0.0  ;;  %v2687_v8 = vmul.f32 %v5406_v18, %v2590_v49  ;;  %vm2664_vm8 = vcmp.ge.f32.partialorder %v2458_v55, 0.0  ;;  %v2681_v3 = vmul.f32 %v5406_v18, %v2458_v55  ;;  %v3812_v34 = vpop.f32.mrb[33].mxu1  ;;  %v3836_v10 = vpop.f32.mrb[33].mxu0 }
 0x511   : > { %v2461_v27 = vpop.f32.mrb[34].mxu1  ;;  %v2593_v38 = vpop.f32.mrb[34].mxu0 }
 0x512   : > { %v2703_v22 = vsel %vm2670_vm7, %v2590_v49, %v2687_v8  ;;  %v2697_v39 = vsel %vm2664_vm8, %v2458_v55, %v2681_v3  ;;  %vm2665_vm9 = vcmp.ge.f32.partialorder %v2461_v27, 0.0  ;;  %v2682_v56 = vmul.f32 %v5406_v18, %v2461_v27  ;;  %v3813_v5 = vpop.f32.mrb[35].mxu1  ;;  %v3837_v44 = vpop.f32.mrb[35].mxu0  ;;  %v5445_v45 = vld [vmem:[#allocation2 + $0x30] sm:$0xff]  ;;  %v2729_v55 = vld [vmem:[#allocation2] sm:$0xff]  ;;  %v2730_v8 = vld [vmem:[#allocation2 + $0x8] sm:$0xff] }
 0x513   : > { %2725 = vst.msk [vmem:[#allocation2 + $0x70] sm:$0xff] %vm1258_vm3, %v2703_v22  ;;  %2719 = vst.msk [vmem:[#allocation2 + $0x40] sm:$0xff] %vm1258_vm3, %v2697_v39  ;;  %vm2671_vm10 = vcmp.ge.f32.partialorder %v2593_v38, 0.0  ;;  %v2688_v9 = vmul.f32 %v5406_v18, %v2593_v38  ;;  %4207 = vrot.lane.b32.xlu1 %v4201_v19, %s4481_s29  ;;  %v5470_v30 = vld [vmem:[#allocation2 + $0x50] sm:$0xff] }
 0x514   : > { %v2698_v59 = vsel %vm2665_vm9, %v2461_v27, %v2682_v56  ;;  %v5447_v20 = vld [vmem:[#allocation2 + $0x38] sm:$0xff] }
 0x515   : > { %2720 = vst.msk [vmem:[#allocation2 + $0x48] sm:$0xff] %vm1258_vm3, %v2698_v59  ;;  %v2704_v16 = vsel %vm2671_vm10, %v2593_v38, %v2688_v9  ;;  %v4211_v6 = vpack.i.bf16 %v5447_v20, %v5445_v45  ;;  %v5465_v51 = vld [vmem:[#allocation2 + $0x58] sm:$0xff] }
 0x516   : > { %2726 = vst.msk [vmem:[#allocation2 + $0x78] sm:$0xff] %vm1258_vm3, %v2704_v16  ;;  %v4236_v43 = vpack.i.bf16 %v5465_v51, %v5470_v30 }
 0x517   : > { %4212 = vrot.lane.b32.xlu1 %v4211_v6, %s4481_s29  ;;  %4217 = vrot.lane.b32.xlu0 %v4211_v6, %s4480_s20  ;;  %v2546_v11 = vpop.f32.mrb[36].mxu1 }
 0x518   : > { %vm2668_vm11 = vcmp.ge.f32.partialorder %v2546_v11, 0.0  ;;  %v2685_v63 = vmul.f32 %v5406_v18, %v2546_v11  ;;  %v3828_v31 = vpop.f32.mrb[37].mxu1 }
 0x519   : > { %v2549_v29 = vpop.f32.mrb[38].mxu1 }
 0x51a   : > { %v2701_v17 = vsel %vm2668_vm11, %v2546_v11, %v2685_v63  ;;  %vm2669_vm12 = vcmp.ge.f32.partialorder %v2549_v29, 0.0  ;;  %v2686_v61 = vmul.f32 %v5406_v18, %v2549_v29  ;;  %v3829_v4 = vpop.f32.mrb[39].mxu1  ;;  %v5458_v35 = vld [vmem:[#allocation2 + $0x40] sm:$0xff] }
 0x51b   : > { %2723 = vst.msk [vmem:[#allocation2 + $0x60] sm:$0xff] %vm1258_vm3, %v2701_v17 }
 0x51c   : > { %v2702_v33 = vsel %vm2669_vm12, %v2549_v29, %v2686_v61  ;;  %v5460_v1 = vld [vmem:[#allocation2 + $0x48] sm:$0xff] }
 0x51d   : > { %2724 = vst.msk [vmem:[#allocation2 + $0x68] sm:$0xff] %vm1258_vm3, %v2702_v33  ;;  %v4231_v53 = vpack.i.bf16 %v5460_v1, %v5458_v35  ;;  %v5485_v60 = vld [vmem:[#allocation2 + $0x78] sm:$0xff] }
 0x51f   : > { %4232 = vrot.lane.b32.xlu0 %v4231_v53, %s4481_s29  ;;  %4222 = vrot.lane.b32.xlu1 %v4231_v53, %s4480_s20  ;;  %v2634_v52 = vpop.f32.mrb[40].mxu1 }
 0x520   : > { %vm2672_vm13 = vcmp.ge.f32.partialorder %v2634_v52, 0.0  ;;  %v2689_v40 = vmul.f32 %v5406_v18, %v2634_v52  ;;  %v3844_v57 = vpop.f32.mrb[41].mxu1 }
 0x521   : > { %v2637_v14 = vpop.f32.mrb[42].mxu1 }
 0x522   : > { %v2705_v62 = vsel %vm2672_vm13, %v2634_v52, %v2689_v40  ;;  %vm2673_vm14 = vcmp.ge.f32.partialorder %v2637_v14, 0.0  ;;  %v2690_v25 = vmul.f32 %v5406_v18, %v2637_v14  ;;  %v3845_v42 = vpop.f32.mrb[43].mxu1  ;;  %v5478_v58 = vld [vmem:[#allocation2 + $0x60] sm:$0xff]  ;;  %v5489_v18 = vld [vmem:[#allocation2 + $0x70] sm:$0xff] }
 0x523   : > { %2727 = vst.msk [vmem:[#allocation2 + $0x80] sm:$0xff] %vm1258_vm3, %v2705_v62  ;;  %4237 = vrot.lane.b32.xlu0 %v4236_v43, %s4480_s20  ;;  %4227 = vrot.lane.b32.xlu1 %v4236_v43, %s4481_s29  ;;  %v4256_v21 = vpack.i.bf16 %v5485_v60, %v5489_v18 }
 0x524   : > { %v2706_v0 = vsel %vm2673_vm14, %v2637_v14, %v2690_v25  ;;  %v5480_v2 = vld [vmem:[#allocation2 + $0x68] sm:$0xff] }
 0x525   : > { %2728 = vst.msk [vmem:[#allocation2 + $0x88] sm:$0xff] %vm1258_vm3, %v2706_v0  ;;  %v4251_v28 = vpack.i.bf16 %v5480_v2, %v5478_v58 }
 0x527   : > { %4252 = vrot.lane.b32.xlu0 %v4251_v28, %s4481_s29  ;;  %4242 = vrot.lane.b32.xlu1 %v4251_v28, %s4480_s20 }
 0x52a   : > { %v2774_v41 = vld [vmem:[#allocation2 + $0x80] sm:$0xff] }
 0x52b   : > { %4257 = vrot.lane.b32.xlu0 %v4256_v21, %s4480_s20  ;;  %4247 = vrot.lane.b32.xlu1 %v4256_v21, %s4481_s29 }
 0x52c   : > { %v2775_v12 = vld [vmem:[#allocation2 + $0x88] sm:$0xff] }
 0x52d   : > { %v4266_v47 = vpack.i.bf16 %v2775_v12, %v2774_v41 }
 0x52f   : > { %4267 = vrot.lane.b32.xlu0 %v4266_v47, %s4481_s29  ;;  %4262 = vrot.lane.b32.xlu1 %v4266_v47, %s4480_s20  ;;  %s4393_s20 = sshll.u32 %s4482_s13, 4  ;;  %s4394_s20 = int_to_ptr.vmem [resolvable:$false] %s4393_s20 }
 0x530   : > { %p4396_p0 = scmp.lt.s32.totalorder %s5603_s18, %s4394_s20 }
 0x533   : > { %4272 = vrot.lane.b32.xlu1 %v4271_v23, %s4481_s29  ;;  %s4395_s29 = scalar_lea.vmem %s4394_s20, 1024 }
 0x534   : > { %p4397_p5 = scmp.lt.s32.totalorder %s4395_s29, %s4389_s24 }
 0x536   : > { %p4398_p9 = por %p4397_p5, %p4396_p0 }
 0x538   : > { %p4399_p12 = pnand %p4398_p9, %p4392_p4 }
 0x579   : > { %v4198_v26 = vpop.permute.xlu1 %4197 }
 0x57a   : > { %v4200_v19 = vunpack.i.h.bf16 %v4198_v26  ;;  %v4199_v49 = vunpack.i.l.bf16 %v4198_v26 }
 0x57c   : > { %v2907_v27 = vsel %vm1258_vm3, %v2730_v8, %v4200_v19  ;;  %v2906_v38 = vsel %vm1258_vm3, %v2729_v55, %v4199_v49 }
 0x581   : > { %v4203_v37 = vpop.permute.xlu1 %4202 }
 0x582   : > { %v4205_v22 = vunpack.i.h.bf16 %v4203_v37  ;;  %v4204_v39 = vunpack.i.l.bf16 %v4203_v37 }
 0x584   : > { %v2909_v6 = vsel %vm1258_vm3, %v5417_v15, %v4205_v22  ;;  %v2908_v11 = vsel %vm1258_vm3, %v5415_v7, %v4204_v39 }
 0x585   : > { %v4208_v3 = vpop.permute.xlu1 %4207 }
 0x586   : > { %v4210_v34 = vunpack.i.h.bf16 %v4208_v3  ;;  %v4209_v10 = vunpack.i.l.bf16 %v4208_v3 }
 0x588   : > { %v2924_v56 = vsel %vm2922_vm2, %v2907_v27, %v4210_v34  ;;  %v2923_v5 = vsel %vm2922_vm2, %v2906_v38, %v4209_v10 }
 0x589   : > { %v2939_v44 = vpack.c.bf16 %v2924_v56, %v2923_v5  ;;  %v4213_v9 = vpop.permute.xlu1 %4212  ;;  %v4218_v29 = vpop.permute.xlu0 %4217 }
 0x58a   : > { %v4215_v59 = vunpack.i.h.bf16 %v4213_v9  ;;  %v4214_v16 = vunpack.i.l.bf16 %v4213_v9  ;;  %v4220_v61 = vunpack.i.h.bf16 %v4218_v29  ;;  %v4219_v4 = vunpack.i.l.bf16 %v4218_v29 }
 0x58b   : > { %3858 = vmatprep.mubr.msk.bf16.mxu0 %vm3002_vm15, %v2939_v44 }
 0x58c   : > { %v2926_v63 = vsel %vm2922_vm2, %v2909_v6, %v4215_v59  ;;  %v2925_v31 = vsel %vm2922_vm2, %v2908_v11, %v4214_v16  ;;  %v2911_v15 = vsel %vm1258_vm3, %v5431_v36, %v4220_v61  ;;  %v2910_v7 = vsel %vm1258_vm3, %v5429_v32, %v4219_v4 }
 0x58d   : > { %v2940_v17 = vpack.c.bf16 %v2926_v63, %v2925_v31 }
 0x58f   : > { %3859 = vmatmul.mubr.msk.bf16.vlgmr.msra.gmra.mrb[0].mxu0 %vm3002_vm15, %v2940_v17 }
 0x591   : > { %v4233_v33 = vpop.permute.xlu0 %4232  ;;  %v4223_v53 = vpop.permute.xlu1 %4222 }
 0x592   : > { %v4235_v52 = vunpack.i.h.bf16 %v4233_v33  ;;  %v4234_v40 = vunpack.i.l.bf16 %v4233_v33  ;;  %v4225_v57 = vunpack.i.h.bf16 %v4223_v53  ;;  %v4224_v14 = vunpack.i.l.bf16 %v4223_v53 }
 0x594   : > { %v2928_v43 = vsel %vm2922_vm2, %v2911_v15, %v4235_v52  ;;  %v2927_v62 = vsel %vm2922_vm2, %v2910_v7, %v4234_v40  ;;  %v2913_v24 = vsel %vm1258_vm3, %v5447_v20, %v4225_v57  ;;  %v2912_v36 = vsel %vm1258_vm3, %v5445_v45, %v4224_v14  ;;  %v3373_v7 = vld [vmem:[%s5657_s5] ss:$0 sm:$0xff] }
 0x595   : > { %v2941_v25 = vpack.c.bf16 %v2928_v43, %v2927_v62  ;;  %v4238_v42 = vpop.permute.xlu0 %4237  ;;  %v4228_v0 = vpop.permute.xlu1 %4227 }
 0x596   : > { %v4230_v28 = vunpack.i.h.bf16 %v4228_v0  ;;  %v4229_v21 = vunpack.i.l.bf16 %v4228_v0  ;;  %v4240_v41 = vunpack.i.h.bf16 %v4238_v42  ;;  %v4239_v12 = vunpack.i.l.bf16 %v4238_v42 }
 0x597   : > { %3862 = vmatprep.mubr.msk.bf16.mxu0 %vm3002_vm15, %v2941_v25  ;;  %v5563_v25 = vstv %s3452_s15 }
 0x598   : > { %v2929_v32 = vsel %vm2922_vm2, %v2912_v36, %v4229_v21  ;;  %v2930_v13 = vsel %vm2922_vm2, %v2913_v24, %v4230_v28  ;;  %v2914_v49 = vsel %vm1258_vm3, %v5458_v35, %v4239_v12  ;;  %v2915_v20 = vsel %vm1258_vm3, %v5460_v1, %v4240_v41 }
 0x599   : > { %v2942_v47 = vpack.c.bf16 %v2930_v13, %v2929_v32  ;;  %v4253_v23 = vpop.permute.xlu0 %4252  ;;  %v4243_v26 = vpop.permute.xlu1 %4242 }
 0x59a   : > { %v4255_v37 = vunpack.i.h.bf16 %v4253_v23  ;;  %v4254_v19 = vunpack.i.l.bf16 %v4253_v23  ;;  %v4245_v45 = vunpack.i.h.bf16 %v4243_v26  ;;  %v4244_v55 = vunpack.i.l.bf16 %v4243_v26 }
 0x59b   : > { %3863 = vmatmul.mubr.msk.bf16.gmra.mrb[4].mxu0 %vm3002_vm15, %v2942_v47 }
 0x59c   : > { %v2932_v8 = vsel %vm2922_vm2, %v2915_v20, %v4255_v37  ;;  %v2931_v3 = vsel %vm2922_vm2, %v2914_v49, %v4254_v19  ;;  %v2917_v39 = vsel %vm1258_vm3, %v5465_v51, %v4245_v45  ;;  %v2916_v35 = vsel %vm1258_vm3, %v5470_v30, %v4244_v55 }
 0x59d   : > { %v2943_v34 = vpack.c.bf16 %v2932_v8, %v2931_v3  ;;  %v4258_v10 = vpop.permute.xlu0 %4257  ;;  %v4248_v27 = vpop.permute.xlu1 %4247 }
 0x59e   : > { %v4250_v38 = vunpack.i.h.bf16 %v4248_v27  ;;  %v4249_v22 = vunpack.i.l.bf16 %v4248_v27  ;;  %v4260_v1 = vunpack.i.h.bf16 %v4258_v10  ;;  %v4259_v56 = vunpack.i.l.bf16 %v4258_v10 }
 0x59f   : > { %3866 = vmatprep.mubr.msk.bf16.mxu0 %vm3002_vm15, %v2943_v34 }
 0x5a0   : > { %v2933_v5 = vsel %vm2922_vm2, %v2916_v35, %v4249_v22  ;;  %v2934_v44 = vsel %vm2922_vm2, %v2917_v39, %v4250_v38  ;;  %v2918_v63 = vsel %vm1258_vm3, %v5478_v58, %v4259_v56  ;;  %v2919_v51 = vsel %vm1258_vm3, %v5480_v2, %v4260_v1 }
 0x5a1   : > { %v2944_v9 = vpack.c.bf16 %v2934_v44, %v2933_v5  ;;  %v4268_v59 = vpop.permute.xlu0 %4267  ;;  %v4263_v16 = vpop.permute.xlu1 %4262  ;;  %v602_v38 = vadd.f32 %v4860_v46, %v3373_v7  ;;  %v594_v39 = vadd.f32 %v3373_v7, %v4862_v48  ;;  %v605_v5 = vadd.f32 %v4865_v50, %v3373_v7 }
 0x5a2   : > { %v4270_v6 = vunpack.i.h.bf16 %v4268_v59  ;;  %v4269_v11 = vunpack.i.l.bf16 %v4268_v59  ;;  %v4265_v30 = vunpack.i.h.bf16 %v4263_v16  ;;  %v4264_v31 = vunpack.i.l.bf16 %v4263_v16 }
 0x5a3   : > { %3867 = vmatmul.mubr.msk.bf16.gmra.mrb[8].mxu0 %vm3002_vm15, %v2944_v9  ;;  %v597_v44 = vadd.f32 %v3373_v7, %v4873_v54 }
 0x5a4   : > { %v2936_v29 = vsel %vm2922_vm2, %v2919_v51, %v4270_v6  ;;  %v2935_v17 = vsel %vm2922_vm2, %v2918_v63, %v4269_v11  ;;  %v2921_v52 = vsel %vm1258_vm3, %v5485_v60, %v4265_v30  ;;  %v2920_v58 = vsel %vm1258_vm3, %v5489_v18, %v4264_v31  ;;  %v5558_v60 = vld [vmem:[%s5659_s7] ss:$0 sm:$0xff] }
 0x5a5   : > { %v2945_v61 = vpack.c.bf16 %v2936_v29, %v2935_v17  ;;  %v4273_v4 = vpop.permute.xlu1 %4272  ;;  %v5561_v57 = vadd.f32 %v5558_v60, %v3373_v7  ;;  %v3901_v9 = vadd.f32 %v5558_v60, %v602_v38  ;;  %v3904_v48 = vadd.f32 %v5558_v60, %v594_v39 }
 0x5a6   : > { %v4275_v33 = vunpack.i.h.bf16 %v4273_v4  ;;  %v4274_v53 = vunpack.i.l.bf16 %v4273_v4  ;;  %v3907_v50 = vadd.f32 %v5558_v60, %v605_v5  ;;  %v3910_v54 = vadd.f32 %v5558_v60, %v597_v44 }
 0x5a7   : > { %3870 = vmatprep.mubr.msk.bf16.mxu0 %vm3002_vm15, %v2945_v61 }
 0x5a8   : > { %v2937_v2 = vsel %vm2922_vm2, %v2920_v58, %v4274_v53  ;;  %v2938_v40 = vsel %vm2922_vm2, %v2921_v52, %v4275_v33 }
 0x5a9   : > { %v2946_v15 = vpack.c.bf16 %v2938_v40, %v2937_v2 }
 0x5ab   : > { %3871 = vmatmul.mubr.msk.bf16.gmra.mrb[52].mxu0 %vm3002_vm15, %v2946_v15 }
 0x662   : > { %v3860_v18 = vpop.f32.mrb[0].mxu0 }
 0x663   : > { %v3061_v14 = vpop.f32.mrb[1].mxu0  ;;  %v3876_v0 = vadd.f32 %v3860_v18, %v3373_v7 }
 0x664   : > { %v3878_v43 = vadd.f32 %v3373_v7, %v3061_v14  ;;  %v3861_v62 = vpop.f32.mrb[2].mxu0 }
 0x665   : > { %v3064_v42 = vpop.f32.mrb[3].mxu0  ;;  %v3877_v36 = vadd.f32 %v3876_v0, %v5558_v60  ;;  %v3881_v13 = vadd.f32 %v5561_v57, %v3861_v62 }
 0x666   : > { %v3879_v28 = vadd.f32 %v3878_v43, %v5558_v60  ;;  %v3883_v21 = vadd.f32 %v5561_v57, %v3064_v42 }
 0x667   : > { %v3160_v32 = vmul.f32 %v3877_v36, %v5563_v25  ;;  %vm3143_vm5 = vcmp.ge.f32.partialorder %v3877_v36, 0.0  ;;  %v3161_v49 = vmul.f32 %v3881_v13, %v5563_v25  ;;  %vm3144_vm1 = vcmp.ge.f32.partialorder %v3881_v13, 0.0 }
 0x668   : > { %vm3141_vm3 = vcmp.ge.f32.partialorder %v3879_v28, 0.0  ;;  %v3158_v24 = vmul.f32 %v3879_v28, %v5563_v25  ;;  %v3159_v41 = vmul.f32 %v3883_v21, %v5563_v25  ;;  %vm3142_vm4 = vcmp.ge.f32.partialorder %v3883_v21, 0.0 }
 0x669   : > { %v3176_v45 = vsel %vm3143_vm5, %v3877_v36, %v3160_v32  ;;  %v3177_v34 = vsel %vm3144_vm1, %v3881_v13, %v3161_v49 }
 0x66a   : > { %v3174_v12 = vsel %vm3141_vm3, %v3879_v28, %v3158_v24  ;;  %v3175_v23 = vsel %vm3142_vm4, %v3883_v21, %v3159_v41 }
 0x66b   : > { %3190 = vxpose.xlu0.b32.start [1/16] (narrow) %v3174_v12, 32 }
 0x66e   : > { %v3864_v47 = vpop.f32.mrb[4].mxu0 }
 0x66f   : > { %v3077_v26 = vpop.f32.mrb[5].mxu0  ;;  %3191 = vxpose.xlu0.b32.cont [2/16] (narrow) %v3175_v23, 32  ;;  %v3885_v35 = vadd.f32 %v5561_v57, %v3864_v47 }
 0x670   : > { %v3865_v37 = vpop.f32.mrb[6].mxu0  ;;  %v3887_v20 = vadd.f32 %v5561_v57, %v3077_v26 }
 0x671   : > { %v3080_v19 = vpop.f32.mrb[7].mxu0  ;;  %v3164_v59 = vmul.f32 %v3885_v35, %v5563_v25  ;;  %v3889_v46 = vadd.f32 %v5561_v57, %v3865_v37  ;;  %vm3147_vm7 = vcmp.ge.f32.partialorder %v3885_v35, 0.0 }
 0x672   : > { %v3162_v55 = vmul.f32 %v3887_v20, %v5563_v25  ;;  %v3891_v8 = vadd.f32 %v5561_v57, %v3080_v19  ;;  %vm3145_vm0 = vcmp.ge.f32.partialorder %v3887_v20, 0.0 }
 0x673   : > { %3192 = vxpose.xlu0.b32.cont [3/16] (narrow) %v3176_v45, 32  ;;  %v3165_v17 = vmul.f32 %v3889_v46, %v5563_v25  ;;  %v3180_v33 = vsel %vm3147_vm7, %v3885_v35, %v3164_v59  ;;  %vm3148_vm8 = vcmp.ge.f32.partialorder %v3889_v46, 0.0 }
 0x674   : > { %v3163_v1 = vmul.f32 %v3891_v8, %v5563_v25  ;;  %v3178_v56 = vsel %vm3145_vm0, %v3887_v20, %v3162_v55  ;;  %vm3146_vm6 = vcmp.ge.f32.partialorder %v3891_v8, 0.0 }
 0x675   : > { %v3181_v58 = vsel %vm3148_vm8, %v3889_v46, %v3165_v17 }
 0x676   : > { %v3868_v3 = vpop.f32.mrb[8].mxu0  ;;  %v3179_v6 = vsel %vm3146_vm6, %v3891_v8, %v3163_v1 }
 0x677   : > { %v3093_v10 = vpop.f32.mrb[9].mxu0  ;;  %3193 = vxpose.xlu0.b32.cont [4/16] (narrow) %v3177_v34, 32  ;;  %v3893_v2 = vadd.f32 %v5561_v57, %v3868_v3 }
 0x678   : > { %v3869_v27 = vpop.f32.mrb[10].mxu0  ;;  %v3895_v61 = vadd.f32 %v5561_v57, %v3093_v10 }
 0x679   : > { %v3096_v22 = vpop.f32.mrb[11].mxu0  ;;  %v3168_v7 = vmul.f32 %v3893_v2, %v5563_v25  ;;  %v3897_v60 = vadd.f32 %v5561_v57, %v3869_v27  ;;  %vm3151_vm11 = vcmp.ge.f32.partialorder %v3893_v2, 0.0 }
 0x67a   : > { %v3166_v53 = vmul.f32 %v3895_v61, %v5563_v25  ;;  %v3899_v52 = vadd.f32 %v5561_v57, %v3096_v22  ;;  %vm3149_vm9 = vcmp.ge.f32.partialorder %v3895_v61, 0.0 }
 0x67b   : > { %3194 = vxpose.xlu0.b32.cont [5/16] (narrow) %v3178_v56, 32  ;;  %v3169_v14 = vmul.f32 %v3897_v60, %v5563_v25  ;;  %v3184_v43 = vsel %vm3151_vm11, %v3893_v2, %v3168_v7  ;;  %vm3152_vm12 = vcmp.ge.f32.partialorder %v3897_v60, 0.0 }
 0x67c   : > { %v3167_v40 = vmul.f32 %v3899_v52, %v5563_v25  ;;  %v3182_v15 = vsel %vm3149_vm9, %v3895_v61, %v3166_v53  ;;  %vm3150_vm10 = vcmp.ge.f32.partialorder %v3899_v52, 0.0 }
 0x67d   : > { %v3185_v42 = vsel %vm3152_vm12, %v3897_v60, %v3169_v14 }
 0x67e   : > { %v3872_v16 = vpop.f32.mrb[52].mxu0  ;;  %v3183_v18 = vsel %vm3150_vm10, %v3899_v52, %v3167_v40 }
 0x67f   : > { %v3902_v11 = vadd.f32 %v3901_v9, %v3872_v16  ;;  %3195 = vxpose.xlu0.b32.cont [6/16] (narrow) %v3179_v6, 32  ;;  %v3109_v63 = vpop.f32.mrb[53].mxu0 }
 0x680   : > { %v3905_v51 = vadd.f32 %v3904_v48, %v3109_v63  ;;  %v3873_v30 = vpop.f32.mrb[54].mxu0 }
 0x681   : > { %v3908_v31 = vadd.f32 %v3907_v50, %v3873_v30  ;;  %v3112_v29 = vpop.f32.mrb[55].mxu0  ;;  %v3172_v57 = vmul.f32 %v3902_v11, %v5563_v25  ;;  %vm3155_vm2 = vcmp.ge.f32.partialorder %v3902_v11, 0.0 }
 0x682   : > { %v3911_v4 = vadd.f32 %v3910_v54, %v3112_v29  ;;  %v3170_v62 = vmul.f32 %v3905_v51, %v5563_v25  ;;  %vm3153_vm13 = vcmp.ge.f32.partialorder %v3905_v51, 0.0 }
 0x683   : > { %3196 = vxpose.xlu0.b32.cont [7/16] (narrow) %v3180_v33, 32  ;;  %v3173_v24 = vmul.f32 %v3908_v31, %v5563_v25  ;;  %v3188_v36 = vsel %vm3155_vm2, %v3902_v11, %v3172_v57  ;;  %vm3156_vm15 = vcmp.ge.f32.partialorder %v3908_v31, 0.0 }
 0x684   : > { %v3171_v0 = vmul.f32 %v3911_v4, %v5563_v25  ;;  %v3186_v28 = vsel %vm3153_vm13, %v3905_v51, %v3170_v62  ;;  %vm3154_vm14 = vcmp.ge.f32.partialorder %v3911_v4, 0.0 }
 0x685   : > { %v3189_v41 = vsel %vm3156_vm15, %v3908_v31, %v3173_v24 }
 0x686   : > { %v3187_v21 = vsel %vm3154_vm14, %v3911_v4, %v3171_v0 }
 0x687   : > { %3197 = vxpose.xlu0.b32.cont [8/16] (narrow) %v3181_v58, 32 }
 0x68b   : > { %3198 = vxpose.xlu0.b32.cont [9/16] (narrow) %v3182_v15, 32 }
 0x68f   : > { %3199 = vxpose.xlu0.b32.cont [10/16] (narrow) %v3183_v18, 32 }
 0x693   : > { %3200 = vxpose.xlu0.b32.cont [11/16] (narrow) %v3184_v43, 32 }
 0x697   : > { %3201 = vxpose.xlu0.b32.cont [12/16] (narrow) %v3185_v42, 32 }
 0x69b   : > { %3202 = vxpose.xlu0.b32.cont [13/16] (narrow) %v3186_v28, 32 }
 0x69f   : > { %3203 = vxpose.xlu0.b32.cont [14/16] (narrow) %v3187_v21, 32 }
 0x6a3   : > { %3204 = vxpose.xlu0.b32.cont [15/16] (narrow) %v3188_v36, 32 }
 0x6a7   : > { %3205 = vxpose.xlu0.b32.end [16/16] (narrow) %v3189_v41, 32 }
 0x6eb   : > { %v3206_v12 = vpop.trf.xlu0 }
 0x6ec   : > { %3222 = vst [vmem:[%s415_s14] sm:$0xff] %v3206_v12 }
 0x6ef   : > { %v3207_v32 = vpop.trf.xlu0 }
 0x6f0   : > { %3223 = vst [vmem:[%s415_s14 + $0x8] sm:$0xff] %v3207_v32 }
 0x6f3   : > { %v3208_v13 = vpop.trf.xlu0 }
 0x6f4   : > { %3224 = vst [vmem:[%s415_s14 + $0x10] sm:$0xff] %v3208_v13 }
 0x6f7   : > { %v3209_v25 = vpop.trf.xlu0 }
 0x6f8   : > { %3225 = vst [vmem:[%s415_s14 + $0x18] sm:$0xff] %v3209_v25 }
 0x6f9   : > { %4402 = shalt.err (!%p4399_p12)
}
 0x6fa   : > { %s4403_s15 = scalar_lea.hbm %s5608_s17, 512  ;;  %s4407_s22 = scalar_lea.hbm %s5661_s9, 1024 }
 0x6fb   : > { %p4404_p2 = scmp.ne.s32.totalorder %s5608_s17, %s4403_s15  ;;  %p4408_p10 = scmp.lt.u32.totalorder %s5608_s17, %s5661_s9 }
 0x6fc   : > { %p4409_p1 = scmp.lt.u32.totalorder %s4407_s22, %s4403_s15  ;;  %p4411_p8 = scmp.lt.u32.totalorder %s4403_s15, %s5608_s17 }
 0x6fd   : > { %p4405_p3 = pnand %p4404_p2, %p4636_p7 }
 0x6fe   : > { %p4410_p6 = por %p4409_p1, %p4408_p10 }
 0x6ff   : > { %p4406_p11 = pneg %p4405_p3 }
 0x700   : > { %p4412_p13 = por %p4411_p8, %p4410_p6 }
 0x702   : > { %p4413_p4 = pnand %p4412_p13, %p4406_p11 }
 0x704   : > { %4416 = shalt.err (!%p4413_p4)
}
 0x705   : > { %s4483_s14 = smov 128   ;;  %s4484_s25 = smov 8  }
 0x706   : > { %4005 = dma.vmem_to_hbm [thread:$0]  (%p4636_p7), %s5603_s18, 512, %s5608_s17, %s3227_s28, %s4483_s14, %s4483_s14, %s4484_s25  }
 0x707 PF: > { %s3255_s27 = sand.u32 1, %s4455_s30   ;;  %p5702_p0 = scmp.ne.s32.totalorder %s5671_s16, 0 }
 0x708   : > { %p5703_p5 = scmp.ge.s32.totalorder %s4467_s12, 2  ;;  %s3256_s0 = scalar_lea.sflag [#allocation5], %s3255_s27 }
 0x70a   : > { %p4022_p9 = pnand %p5703_p5, %p5702_p0 }
 0x70c   : > { %4450 = dma.done.wait (!%p4022_p9), %s3256_s0, 512  }
 0x70d   : > { %4452 = vsyncadd (!%p4022_p9), %s3256_s0, 4294966784  ;;  %s5704_s24 = sld [smem:[#allocation17_spill]]  ;;  %s5705_s11 = sld [smem:[#allocation18_spill]] }
 0x70e   : > { %p26_p12 = scmp.ge.s32.totalorder %s4626_s19, 4   ;;  %s5706_s30 = smov %s4459_s10 }
 0x70f   : > { %s5708_s12 = smov %s4626_s19 }
 0x710   :  { %28 = sbr.rel (!%p26_p12) target bundleno = 12 (0xc), region = 130 }
 0x713   : > { %s5707_s10 = smov %s5704_s24 }
 0x717   :  { %3261 = vsyncpa [#allocation4], 1 }
 0x718   :  { %3263 = vsyncpa [#allocation4 + $0x1], 1 }
 0x719   :  { %3264 = vsyncpa [#allocation8], 1 }
 0x71a   :  { %3266 = vsyncpa [#allocation8 + $0x1], 1 }
 0x71b   :  { %3267 = vsyncpa [#allocation5], 1 }
 0x71c   :  { %3269 = vsyncpa [#allocation5 + $0x1], 1 }
 0x71d   :  { %3270 = vsyncpa [#allocation6], 1 }
 0x71e   :  { %3272 = vsyncpa [#allocation6 + $0x1], 1 }

</bundles_post_ra>
